<compile_context>
chip_gen: v5e
topology: v5e:2x2
jax: 0.10.0
libtpu: 0.0.40
codegen_flags: <defaults>
</compile_context>

<pallas_src>
import functools

import jax
import jax.numpy as jnp
import numpy as np
from jax.experimental import pallas as pl
from jax.experimental.pallas import tpu as pltpu


_PARAM_ORDER = ("ln1w", "ln1b", "wqkv", "weff", "beff",
                "ln2w", "ln2b", "w1", "b1", "w2", "b2")


# ----------------------------------------------------------------------------
# Fused kernel: one grid step == one batch tile through the WHOLE stack.
# ----------------------------------------------------------------------------
def _fused_kernel(x_ref, ln1w_ref, ln1b_ref, wqkv_ref, weff_ref, beff_ref,
                  ln2w_ref, ln2b_ref, w1_ref, b1_ref, w2_ref, b2_ref,
                  o_ref, *, N, D, H, dh, depth, eps, scale):
    f32, bf16 = jnp.float32, jnp.bfloat16
    MB = x_ref.shape[0]                      # B_BLK * N rows in this tile
    BB = MB // N                             # batch elements in this tile
    inner = H * dh

    # Position-within-sequence index, used to zero the temporal-shift terms at
    # sequence boundaries (rows of different batch elements are adjacent in
    # the flattened (B_BLK*N, D) layout, so boundary rows must be masked).
    n_idx = jax.lax.broadcasted_iota(jnp.int32, (MB, D), 0) % N
    is_first = n_idx == 0
    is_last = n_idx == N - 1
    zrow = jnp.zeros((1, D), f32)

    x = x_ref[...]                           # (MB, D) f32 residual stream

    for l in range(depth):                   # depth is small & static
        # ---------------- PreNorm(LayerNorm) ----------------
        mu = jnp.mean(x, axis=-1, keepdims=True)
        var = jnp.mean((x - mu) ** 2, axis=-1, keepdims=True)
        xn = (x - mu) * jax.lax.rsqrt(var + eps) * ln1w_ref[l] + ln1b_ref[l]

        # -------- QKV projection: ONE (MB, D) @ (D, 3*H*dh) MXU pass --------
        qkv = jnp.dot(xn.astype(bf16), wqkv_ref[l],
                      preferred_element_type=f32).astype(bf16)   # (MB, 3*inner)

        # -------- attention, batched over the batch-tile axis per head ------
        a_heads = []
        for h in range(H):
            q = qkv[:, h * dh:(h + 1) * dh].reshape(BB, N, dh)
            k = qkv[:, inner + h * dh:inner + (h + 1) * dh].reshape(BB, N, dh)
            v = qkv[:, 2 * inner + h * dh:
                    2 * inner + (h + 1) * dh].reshape(BB, N, dh)
            dots = jnp.einsum("bnd,bmd->bnm", q, k,
                              preferred_element_type=f32) * scale  # (BB, N, N)
            dots = dots - jnp.max(dots, axis=-1, keepdims=True)
            e = jnp.exp(dots)
            attn = e / jnp.sum(e, axis=-1, keepdims=True)          # exact
            a_heads.append(jnp.einsum("bnm,bmd->bnd", attn.astype(bf16), v,
                                      preferred_element_type=f32))
        # head-major (MB, H*dh): matches weff row ordering from _pack_params
        a_flat = jnp.concatenate(a_heads, axis=-1).reshape(MB, inner)

        # ---- STA conv (3 taps) + head-sum + to_out folded: ONE MXU pass ----
        m_taps = jnp.dot(a_flat.astype(bf16), weff_ref[l],
                         preferred_element_type=f32)               # (MB, 3*D)
        m_prev = m_taps[:, :D]
        m_cur = m_taps[:, D:2 * D]
        m_next = m_taps[:, 2 * D:]

        # Temporal shifts within each length-N sequence, zero padded at the
        # sequence edges (mask also kills cross-batch leakage between tiles'
        # adjacent rows).
        prev = jnp.where(is_first, 0.0,
                         jnp.concatenate([zrow, m_prev[:-1, :]], axis=0))
        nxt = jnp.where(is_last, 0.0,
                        jnp.concatenate([m_next[1:, :], zrow], axis=0))

        x = x + beff_ref[l] + prev + m_cur + nxt                   # residual 1

        # ---------------- PreNorm(LayerNorm) + FeedForward ----------------
        mu2 = jnp.mean(x, axis=-1, keepdims=True)
        var2 = jnp.mean((x - mu2) ** 2, axis=-1, keepdims=True)
        xn2 = (x - mu2) * jax.lax.rsqrt(var2 + eps) * ln2w_ref[l] + ln2b_ref[l]

        h1 = jnp.dot(xn2.astype(bf16), w1_ref[l],
                     preferred_element_type=f32) + b1_ref[l]
        h1 = jnp.maximum(h1, 0.0)                                   # ReLU
        y2 = jnp.dot(h1.astype(bf16), w2_ref[l],
                     preferred_element_type=f32) + b2_ref[l]

        x = x + y2                                                  # residual 2

    o_ref[...] = x


# ----------------------------------------------------------------------------
# Wrapper-side parameter preprocessing (pure JAX, outside the kernel).
# ----------------------------------------------------------------------------
def _pack_params(params, *, heads, dim_head, compute_dtype=jnp.bfloat16):
    H, dh = heads, dim_head
    layers = []
    for p in params:
        D = p["wqkv"].shape[0]

        # Fold the STA conv (effective weight-norm weight) and head-sum into
        # the to_out projection:
        #   weff2d[h*dh + d, t*D + k] = sum_o convw[o, h, t] * wo[o*dh + d, k]
        wo3 = p["wo"].reshape(H, dh, D)          # wo3[o, d, :] = wo[o*dh+d, :]
        weff = jnp.einsum("oit,odk->idtk", p["convw"], wo3)   # (H, dh, 3, D)
        weff2d = weff.reshape(H * dh, 3 * D)
        beff = (p["bo"][0] + jnp.einsum("o,ok->k", p["convb"],
                                        wo3.sum(axis=1)))[None, :]   # (1, D)

        layers.append(dict(
            ln1w=p["ln1w"], ln1b=p["ln1b"],
            wqkv=p["wqkv"].astype(compute_dtype),       # (D, 3*H*dh), [q|k|v]
            weff=weff2d.astype(compute_dtype),          # (H*dh, 3*D)
            beff=beff.astype(jnp.float32),
            ln2w=p["ln2w"], ln2b=p["ln2b"],
            w1=p["w1"].astype(compute_dtype), b1=p["b1"].astype(jnp.float32),
            w2=p["w2"].astype(compute_dtype), b2=p["b2"].astype(jnp.float32)))
    return {k: jnp.stack([lay[k] for lay in layers], axis=0)
            for k in _PARAM_ORDER}


def temporal_transformer(x, params, *, heads, dim_head, batch_block=None):
    """Full TemporalTransformer forward in ONE Pallas kernel.  x: (B, N, D)."""
    B, N, D = x.shape
    H, dh = heads, dim_head
    depth = len(params)
    scale = dh ** -0.5

    # Batch tile: target ~256 MXU rows (M = batch_block * N) per grid step
    # (fills v6e/v7x 256-row systolic pushes; >=128 also fills v5e).  Never
    # exceed B; keep multiple grid steps when B allows (feeds both v7x cores).
    if batch_block is None:
        batch_block = max(1, min(B, max(1, 256 // N)))
    n_tiles = pl.cdiv(B, batch_block)
    # (8,128) rule: with >1 tile the row-block must be sublane aligned.
    if n_tiles > 1 and (batch_block * N) % 8 != 0:
        batch_block = n_tiles * batch_block
        n_tiles = 1
    Bp = n_tiles * batch_block
    MB = batch_block * N

    stacked = _pack_params(params, heads=H, dim_head=dh)

    # Flatten activations to (B*N, D) wrapper-side; pad batch to a multiple of
    # the batch tile (padded rows compute finite garbage and are sliced away).
    x2d = x.reshape(B * N, D).astype(jnp.float32)
    if Bp != B:
        x2d = jnp.pad(x2d, ((0, (Bp - B) * N), (0, 0)))

    kernel = functools.partial(_fused_kernel, N=N, D=D, H=H, dh=dh,
                               depth=depth, eps=1e-5, scale=scale)

    # x streams per batch tile; every weight is one full-stack block with a
    # constant index_map -> DMA'd once, VMEM-resident for the whole call.
    in_specs = [pl.BlockSpec((MB, D), lambda i: (i, 0))]
    for name in _PARAM_ORDER:
        nd = stacked[name].ndim
        in_specs.append(
            pl.BlockSpec(stacked[name].shape, lambda i, _nd=nd: (0,) * _nd))

    out = pl.pallas_call(
        kernel,
        out_shape=jax.ShapeDtypeStruct((Bp * N, D), jnp.float32),
        grid=(n_tiles,),
        in_specs=in_specs,
        out_specs=pl.BlockSpec((MB, D), lambda i: (i, 0)),
        compiler_params=pltpu.CompilerParams(
            dimension_semantics=("parallel",)),
    )(x2d, *[stacked[name] for name in _PARAM_ORDER])

    return out[:B * N].reshape(B, N, D)


# ----------------------------------------------------------------------------
# Deterministic parameter initialization (synthetic; mirrors module __init__).
# ----------------------------------------------------------------------------
def init_params(key, *, depth, dim, heads, dim_head, mlp_dim, anchor=3):
    inner = heads * dim_head
    params = []
    for layer in range(depth):
        k = jax.random.fold_in(key, layer)
        ks = jax.random.split(k, 12)
        rnd = lambda kk, shape, s=0.02: s * jax.random.normal(kk, shape, jnp.float32)

        ln1w = 1.0 + rnd(ks[0], (1, dim), 0.1)
        ln1b = rnd(ks[1], (1, dim), 0.1)
        ln2w = 1.0 + rnd(ks[2], (1, dim), 0.1)
        ln2b = rnd(ks[3], (1, dim), 0.1)

        # to_qkv: torch weight (3*inner, dim); store transposed (dim, 3*inner)
        wqkv = rnd(ks[4], (dim, 3 * inner))

        # STA weight-norm conv: v (H, H, anchor, 1), g (H,)
        v = rnd(ks[5], (heads, heads, anchor, 1), 0.2)
        g = 1.0 + 0.1 * jax.random.uniform(ks[6], (heads,), jnp.float32)
        vnorm = jnp.sqrt(jnp.sum(v * v, axis=(1, 2, 3), keepdims=True)) + 1e-12
        convw4 = g.reshape(heads, 1, 1, 1) * v / vnorm          # effective OIHW
        convw = convw4[..., 0]                                   # (H, H, anchor)
        convb = rnd(ks[7], (heads,), 0.05)

        # to_out: torch weight (dim, inner); store transposed (inner, dim)
        wo = rnd(ks[8], (inner, dim))
        bo = rnd(ks[9], (1, dim), 0.05)

        # FeedForward
        w1 = rnd(ks[10], (dim, mlp_dim))
        b1 = 0.05 * jax.random.normal(jax.random.fold_in(ks[10], 1), (1, mlp_dim))
        w2 = rnd(ks[11], (mlp_dim, dim))
        b2 = 0.05 * jax.random.normal(jax.random.fold_in(ks[11], 1), (1, dim))

        params.append(dict(ln1w=ln1w, ln1b=ln1b, wqkv=wqkv, convw=convw,
                           convw4=convw4, convb=convb, wo=wo, bo=bo,
                           ln2w=ln2w, ln2b=ln2b, w1=w1, b1=b1, w2=w2, b2=b2))
    return params


# ----------------------------------------------------------------------------
# Pure-JAX reference (mirrors the PyTorch forward) for a sanity check.
# ----------------------------------------------------------------------------
def ref_forward(x, params, *, heads, dim_head, eps=1e-5):
    B, N, D = x.shape
    H, dh = heads, dim_head
    scale = dh ** -0.5

    def ln(t, w, b):
        mu = jnp.mean(t, axis=-1, keepdims=True)
        var = jnp.mean((t - mu) ** 2, axis=-1, keepdims=True)
        return (t - mu) / jnp.sqrt(var + eps) * w + b

    for p in params:
        xn = ln(x, p["ln1w"][0], p["ln1b"][0])
        qkv = xn @ p["wqkv"]
        q, k, v = jnp.split(qkv, 3, axis=-1)
        to_heads = lambda t: t.reshape(B, N, H, dh).transpose(0, 2, 1, 3)
        q, k, v = map(to_heads, (q, k, v))
        dots = jnp.einsum("bhnd,bhmd->bhnm", q, k) * scale
        attn = jax.nn.softmax(dots, axis=-1)
        out = jnp.einsum("bhnm,bhmd->bhnd", attn, v)            # (B, H, N, dh)
        out = jax.lax.conv_general_dilated(
            out, p["convw4"], window_strides=(1, 1), padding=((1, 1), (0, 0)),
            dimension_numbers=("NCHW", "OIHW", "NCHW"))
        out = out + p["convb"].reshape(1, H, 1, 1)
        out = out.transpose(0, 2, 1, 3).reshape(B, N, H * dh)
        x = x + out @ p["wo"] + p["bo"][0]
        xn2 = ln(x, p["ln2w"][0], p["ln2b"][0])
        x = x + jnp.maximum(xn2 @ p["w1"] + p["b1"][0], 0.0) @ p["w2"] + p["b2"][0]
    return x


# ----------------------------------------------------------------------------
if __name__ == "__main__":
    # Small config: dim=32, depth=2, heads=4, dim_head=8, mlp_dim=64
    B, N, D = 2, 8, 32
    HEADS, DIM_HEAD, MLP, DEPTH = 4, 8, 64, 2

    key = jax.random.PRNGKey(0)
    x = jax.random.normal(jax.random.fold_in(key, 999), (B, N, D), jnp.float32)
    params = init_params(key, depth=DEPTH, dim=D, heads=HEADS,
                         dim_head=DIM_HEAD, mlp_dim=MLP)

    fwd = jax.jit(functools.partial(temporal_transformer,
                                    heads=HEADS, dim_head=DIM_HEAD))
    y = jax.block_until_ready(fwd(x, params))

    y_ref = jax.block_until_ready(
        ref_forward(x, params, heads=HEADS, dim_head=DIM_HEAD))

    # bf16 MXU operands -> keep 2e-2 tolerance (softmax reciprocal is exact).
    np.testing.assert_allclose(np.asarray(y), np.asarray(y_ref),
                               rtol=2e-2, atol=2e-2)
    print("KERNEL_OK")
</pallas_src>

<mosaic_0001>
module attributes {stable_mosaic.version = 11 : i64} {
  func.func @_fused_kernel(%arg0: i32, %arg1: memref<16x32xf32, #tpu.memory_space<vmem>>, %arg2: memref<2x1x32xf32, #tpu.memory_space<vmem>>, %arg3: memref<2x1x32xf32, #tpu.memory_space<vmem>>, %arg4: memref<2x32x96xbf16, #tpu.memory_space<vmem>>, %arg5: memref<2x32x96xbf16, #tpu.memory_space<vmem>>, %arg6: memref<2x1x32xf32, #tpu.memory_space<vmem>>, %arg7: memref<2x1x32xf32, #tpu.memory_space<vmem>>, %arg8: memref<2x1x32xf32, #tpu.memory_space<vmem>>, %arg9: memref<2x32x64xbf16, #tpu.memory_space<vmem>>, %arg10: memref<2x1x64xf32, #tpu.memory_space<vmem>>, %arg11: memref<2x64x32xbf16, #tpu.memory_space<vmem>>, %arg12: memref<2x1x32xf32, #tpu.memory_space<vmem>>, %arg13: memref<16x32xf32, #tpu.memory_space<vmem>>) attributes {dimension_semantics = [#tpu.dimension_semantics<parallel>], iteration_bounds = array<i64: 1>, scalar_prefetch = 0 : i64, scratch_operands = 0 : i64, tpu.core_type = #tpu.core_type<tc>, window_params = [{transform_indices = @transform_0, window_bounds = array<i64: 16, 32>}, {pipeline_mode = #tpu.pipeline_mode<synchronous>, transform_indices = @transform_1, window_bounds = array<i64: 2, 1, 32>}, {pipeline_mode = #tpu.pipeline_mode<synchronous>, transform_indices = @transform_2, window_bounds = array<i64: 2, 1, 32>}, {pipeline_mode = #tpu.pipeline_mode<synchronous>, transform_indices = @transform_3, window_bounds = array<i64: 2, 32, 96>}, {pipeline_mode = #tpu.pipeline_mode<synchronous>, transform_indices = @transform_4, window_bounds = array<i64: 2, 32, 96>}, {pipeline_mode = #tpu.pipeline_mode<synchronous>, transform_indices = @transform_5, window_bounds = array<i64: 2, 1, 32>}, {pipeline_mode = #tpu.pipeline_mode<synchronous>, transform_indices = @transform_6, window_bounds = array<i64: 2, 1, 32>}, {pipeline_mode = #tpu.pipeline_mode<synchronous>, transform_indices = @transform_7, window_bounds = array<i64: 2, 1, 32>}, {pipeline_mode = #tpu.pipeline_mode<synchronous>, transform_indices = @transform_8, window_bounds = array<i64: 2, 32, 64>}, {pipeline_mode = #tpu.pipeline_mode<synchronous>, transform_indices = @transform_9, window_bounds = array<i64: 2, 1, 64>}, {pipeline_mode = #tpu.pipeline_mode<synchronous>, transform_indices = @transform_10, window_bounds = array<i64: 2, 64, 32>}, {pipeline_mode = #tpu.pipeline_mode<synchronous>, transform_indices = @transform_11, window_bounds = array<i64: 2, 1, 32>}, {transform_indices = @transform_12, window_bounds = array<i64: 16, 32>}]} {
    %0 = tpu.iota {dimensions = array<i32: 0>} : vector<16x32xi32>
    %c8_i32 = arith.constant 8 : i32
    %c0_i32 = arith.constant 0 : i32
    %1 = arith.cmpi eq, %c8_i32, %c0_i32 : i32
    %c1_i32 = arith.constant 1 : i32
    %2 = arith.select %1, %c1_i32, %c8_i32 : i32
    %3 = vector.broadcast %2 : i32 to vector<16x32xi32>
    %4 = arith.remsi %0, %3 : vector<16x32xi32>
    %c0_i32_0 = arith.constant 0 : i32
    %5 = vector.broadcast %c0_i32_0 : i32 to vector<16x32xi32>
    %6 = arith.cmpi ne, %4, %5 : vector<16x32xi32>
    %c0_i32_1 = arith.constant 0 : i32
    %7 = vector.broadcast %c0_i32_1 : i32 to vector<16x32xi32>
    %8 = arith.cmpi slt, %4, %7 : vector<16x32xi32>
    %c0_i32_2 = arith.constant 0 : i32
    %9 = arith.cmpi slt, %2, %c0_i32_2 : i32
    %10 = vector.broadcast %9 : i1 to vector<16x32xi1>
    %11 = vector.broadcast %10 : vector<16x32xi1> to vector<16x32xi1>
    %12 = arith.xori %8, %11 : vector<16x32xi1>
    %13 = arith.andi %12, %6 : vector<16x32xi1>
    %14 = vector.broadcast %2 : i32 to vector<16x32xi32>
    %15 = arith.addi %4, %14 : vector<16x32xi32>
    %16 = arith.select %13, %15, %4 : vector<16x32xi1>, vector<16x32xi32>
    %c0_i32_3 = arith.constant 0 : i32
    %17 = vector.broadcast %c0_i32_3 : i32 to vector<16x32xi32>
    %18 = arith.cmpi eq, %16, %17 : vector<16x32xi32>
    %c7_i32 = arith.constant 7 : i32
    %19 = vector.broadcast %c7_i32 : i32 to vector<16x32xi32>
    %20 = arith.cmpi eq, %16, %19 : vector<16x32xi32>
    %cst = arith.constant 0.000000e+00 : f32
    %21 = vector.broadcast %cst : f32 to vector<1x32xf32>
    %c0 = arith.constant 0 : index
    %c0_4 = arith.constant 0 : index
    %22 = vector.load %arg1[%c0, %c0_4] : memref<16x32xf32, #tpu.memory_space<vmem>>, vector<16x32xf32>
    %cst_5 = arith.constant dense<0.000000e+00> : vector<16xf32>
    %23 = vector.multi_reduction <add>, %22, %cst_5 [1] : vector<16x32xf32> to vector<16xf32>
    %24 = vector.shape_cast %23 : vector<16xf32> to vector<16x1xf32>
    %cst_6 = arith.constant 3.200000e+01 : f32
    %25 = vector.broadcast %cst_6 : f32 to vector<16x1xf32>
    %26 = arith.divf %24, %25 : vector<16x1xf32>
    %27 = vector.broadcast %26 : vector<16x1xf32> to vector<16x32xf32>
    %28 = arith.subf %22, %27 : vector<16x32xf32>
    %29 = arith.mulf %28, %28 : vector<16x32xf32>
    %cst_7 = arith.constant dense<0.000000e+00> : vector<16xf32>
    %30 = vector.multi_reduction <add>, %29, %cst_7 [1] : vector<16x32xf32> to vector<16xf32>
    %31 = vector.shape_cast %30 : vector<16xf32> to vector<16x1xf32>
    %cst_8 = arith.constant 3.200000e+01 : f32
    %32 = vector.broadcast %cst_8 : f32 to vector<16x1xf32>
    %33 = arith.divf %31, %32 : vector<16x1xf32>
    %34 = vector.broadcast %26 : vector<16x1xf32> to vector<16x32xf32>
    %35 = arith.subf %22, %34 : vector<16x32xf32>
    %cst_9 = arith.constant 9.99999974E-6 : f32
    %36 = vector.broadcast %cst_9 : f32 to vector<16x1xf32>
    %37 = arith.addf %33, %36 : vector<16x1xf32>
    %38 = math.rsqrt %37 : vector<16x1xf32>
    %39 = vector.broadcast %38 : vector<16x1xf32> to vector<16x32xf32>
    %40 = arith.mulf %35, %39 : vector<16x32xf32>
    %c0_10 = arith.constant 0 : index
    %c0_11 = arith.constant 0 : index
    %c0_12 = arith.constant 0 : index
    %41 = vector.load %arg2[%c0_10, %c0_11, %c0_12] : memref<2x1x32xf32, #tpu.memory_space<vmem>>, vector<1x1x32xf32>
    %42 = vector.shape_cast %41 : vector<1x1x32xf32> to vector<1x32xf32>
    %43 = vector.broadcast %42 : vector<1x32xf32> to vector<16x32xf32>
    %44 = arith.mulf %40, %43 : vector<16x32xf32>
    %c0_13 = arith.constant 0 : index
    %c0_14 = arith.constant 0 : index
    %c0_15 = arith.constant 0 : index
    %45 = vector.load %arg3[%c0_13, %c0_14, %c0_15] : memref<2x1x32xf32, #tpu.memory_space<vmem>>, vector<1x1x32xf32>
    %46 = vector.shape_cast %45 : vector<1x1x32xf32> to vector<1x32xf32>
    %47 = vector.broadcast %46 : vector<1x32xf32> to vector<16x32xf32>
    %48 = arith.addf %44, %47 : vector<16x32xf32>
    %49 = arith.truncf %48 : vector<16x32xf32> to vector<16x32xbf16>
    %c0_16 = arith.constant 0 : index
    %c0_17 = arith.constant 0 : index
    %c0_18 = arith.constant 0 : index
    %50 = vector.load %arg4[%c0_16, %c0_17, %c0_18] : memref<2x32x96xbf16, #tpu.memory_space<vmem>>, vector<1x32x96xbf16>
    %51 = vector.shape_cast %50 : vector<1x32x96xbf16> to vector<32x96xbf16>
    %cst_19 = arith.constant dense<0.000000e+00> : vector<16x96xf32>
    %52 = tpu.matmul %49, %51, %cst_19 {dimension_numbers = #tpu.dot_dimension_numbers<[1], [0], [0], [1], [0, 0, 1, 1], [], []>} : vector<16x32xbf16>, vector<32x96xbf16>, vector<16x96xf32> -> vector<16x96xf32>
    %53 = arith.truncf %52 : vector<16x96xf32> to vector<16x96xbf16>
    %54 = vector.extract_strided_slice %53 {offsets = [0, 0], sizes = [16, 8], strides = [1, 1]} : vector<16x96xbf16> to vector<16x8xbf16>
    %55 = vector.shape_cast %54 : vector<16x8xbf16> to vector<2x8x8xbf16>
    %56 = vector.extract_strided_slice %53 {offsets = [0, 32], sizes = [16, 8], strides = [1, 1]} : vector<16x96xbf16> to vector<16x8xbf16>
    %57 = vector.shape_cast %56 : vector<16x8xbf16> to vector<2x8x8xbf16>
    %58 = vector.extract_strided_slice %53 {offsets = [0, 64], sizes = [16, 8], strides = [1, 1]} : vector<16x96xbf16> to vector<16x8xbf16>
    %59 = vector.shape_cast %58 : vector<16x8xbf16> to vector<2x8x8xbf16>
    "tpu.trace_start"() <{level = 10 : i32, message = "bnd,bmd->bnm"}> : () -> ()
    %cst_20 = arith.constant dense<0.000000e+00> : vector<2x8x8xf32>
    %60 = tpu.matmul %55, %57, %cst_20 {dimension_numbers = #tpu.dot_dimension_numbers<[2], [2], [1], [1], [0, 0, 0, 1, 1, 1], [0], [0]>} : vector<2x8x8xbf16>, vector<2x8x8xbf16>, vector<2x8x8xf32> -> vector<2x8x8xf32>
    "tpu.trace_stop"() : () -> ()
    %cst_21 = arith.constant 0.353553385 : f32
    %61 = vector.broadcast %cst_21 : f32 to vector<2x8x8xf32>
    %62 = arith.mulf %60, %61 : vector<2x8x8xf32>
    %cst_22 = arith.constant dense<0xFF800000> : vector<2x8xf32>
    %63 = vector.multi_reduction <maximumf>, %62, %cst_22 [2] : vector<2x8x8xf32> to vector<2x8xf32>
    %64 = vector.shape_cast %63 : vector<2x8xf32> to vector<2x8x1xf32>
    %65 = vector.broadcast %64 : vector<2x8x1xf32> to vector<2x8x8xf32>
    %66 = arith.subf %62, %65 : vector<2x8x8xf32>
    %67 = math.exp %66 : vector<2x8x8xf32>
    %cst_23 = arith.constant dense<0.000000e+00> : vector<2x8xf32>
    %68 = vector.multi_reduction <add>, %67, %cst_23 [2] : vector<2x8x8xf32> to vector<2x8xf32>
    %69 = vector.shape_cast %68 : vector<2x8xf32> to vector<2x8x1xf32>
    %70 = vector.broadcast %69 : vector<2x8x1xf32> to vector<2x8x8xf32>
    %71 = arith.divf %67, %70 : vector<2x8x8xf32>
    %72 = arith.truncf %71 : vector<2x8x8xf32> to vector<2x8x8xbf16>
    "tpu.trace_start"() <{level = 10 : i32, message = "bnm,bmd->bnd"}> : () -> ()
    %cst_24 = arith.constant dense<0.000000e+00> : vector<2x8x8xf32>
    %73 = tpu.matmul %72, %59, %cst_24 {dimension_numbers = #tpu.dot_dimension_numbers<[2], [1], [1], [2], [0, 0, 0, 1, 1, 2], [0], [0]>} : vector<2x8x8xbf16>, vector<2x8x8xbf16>, vector<2x8x8xf32> -> vector<2x8x8xf32>
    "tpu.trace_stop"() : () -> ()
    %74 = vector.extract_strided_slice %53 {offsets = [0, 8], sizes = [16, 8], strides = [1, 1]} : vector<16x96xbf16> to vector<16x8xbf16>
    %75 = vector.shape_cast %74 : vector<16x8xbf16> to vector<2x8x8xbf16>
    %76 = vector.extract_strided_slice %53 {offsets = [0, 40], sizes = [16, 8], strides = [1, 1]} : vector<16x96xbf16> to vector<16x8xbf16>
    %77 = vector.shape_cast %76 : vector<16x8xbf16> to vector<2x8x8xbf16>
    %78 = vector.extract_strided_slice %53 {offsets = [0, 72], sizes = [16, 8], strides = [1, 1]} : vector<16x96xbf16> to vector<16x8xbf16>
    %79 = vector.shape_cast %78 : vector<16x8xbf16> to vector<2x8x8xbf16>
    "tpu.trace_start"() <{level = 10 : i32, message = "bnd,bmd->bnm"}> : () -> ()
    %cst_25 = arith.constant dense<0.000000e+00> : vector<2x8x8xf32>
    %80 = tpu.matmul %75, %77, %cst_25 {dimension_numbers = #tpu.dot_dimension_numbers<[2], [2], [1], [1], [0, 0, 0, 1, 1, 1], [0], [0]>} : vector<2x8x8xbf16>, vector<2x8x8xbf16>, vector<2x8x8xf32> -> vector<2x8x8xf32>
    "tpu.trace_stop"() : () -> ()
    %cst_26 = arith.constant 0.353553385 : f32
    %81 = vector.broadcast %cst_26 : f32 to vector<2x8x8xf32>
    %82 = arith.mulf %80, %81 : vector<2x8x8xf32>
    %cst_27 = arith.constant dense<0xFF800000> : vector<2x8xf32>
    %83 = vector.multi_reduction <maximumf>, %82, %cst_27 [2] : vector<2x8x8xf32> to vector<2x8xf32>
    %84 = vector.shape_cast %83 : vector<2x8xf32> to vector<2x8x1xf32>
    %85 = vector.broadcast %84 : vector<2x8x1xf32> to vector<2x8x8xf32>
    %86 = arith.subf %82, %85 : vector<2x8x8xf32>
    %87 = math.exp %86 : vector<2x8x8xf32>
    %cst_28 = arith.constant dense<0.000000e+00> : vector<2x8xf32>
    %88 = vector.multi_reduction <add>, %87, %cst_28 [2] : vector<2x8x8xf32> to vector<2x8xf32>
    %89 = vector.shape_cast %88 : vector<2x8xf32> to vector<2x8x1xf32>
    %90 = vector.broadcast %89 : vector<2x8x1xf32> to vector<2x8x8xf32>
    %91 = arith.divf %87, %90 : vector<2x8x8xf32>
    %92 = arith.truncf %91 : vector<2x8x8xf32> to vector<2x8x8xbf16>
    "tpu.trace_start"() <{level = 10 : i32, message = "bnm,bmd->bnd"}> : () -> ()
    %cst_29 = arith.constant dense<0.000000e+00> : vector<2x8x8xf32>
    %93 = tpu.matmul %92, %79, %cst_29 {dimension_numbers = #tpu.dot_dimension_numbers<[2], [1], [1], [2], [0, 0, 0, 1, 1, 2], [0], [0]>} : vector<2x8x8xbf16>, vector<2x8x8xbf16>, vector<2x8x8xf32> -> vector<2x8x8xf32>
    "tpu.trace_stop"() : () -> ()
    %94 = vector.extract_strided_slice %53 {offsets = [0, 16], sizes = [16, 8], strides = [1, 1]} : vector<16x96xbf16> to vector<16x8xbf16>
    %95 = vector.shape_cast %94 : vector<16x8xbf16> to vector<2x8x8xbf16>
    %96 = vector.extract_strided_slice %53 {offsets = [0, 48], sizes = [16, 8], strides = [1, 1]} : vector<16x96xbf16> to vector<16x8xbf16>
    %97 = vector.shape_cast %96 : vector<16x8xbf16> to vector<2x8x8xbf16>
    %98 = vector.extract_strided_slice %53 {offsets = [0, 80], sizes = [16, 8], strides = [1, 1]} : vector<16x96xbf16> to vector<16x8xbf16>
    %99 = vector.shape_cast %98 : vector<16x8xbf16> to vector<2x8x8xbf16>
    "tpu.trace_start"() <{level = 10 : i32, message = "bnd,bmd->bnm"}> : () -> ()
    %cst_30 = arith.constant dense<0.000000e+00> : vector<2x8x8xf32>
    %100 = tpu.matmul %95, %97, %cst_30 {dimension_numbers = #tpu.dot_dimension_numbers<[2], [2], [1], [1], [0, 0, 0, 1, 1, 1], [0], [0]>} : vector<2x8x8xbf16>, vector<2x8x8xbf16>, vector<2x8x8xf32> -> vector<2x8x8xf32>
    "tpu.trace_stop"() : () -> ()
    %cst_31 = arith.constant 0.353553385 : f32
    %101 = vector.broadcast %cst_31 : f32 to vector<2x8x8xf32>
    %102 = arith.mulf %100, %101 : vector<2x8x8xf32>
    %cst_32 = arith.constant dense<0xFF800000> : vector<2x8xf32>
    %103 = vector.multi_reduction <maximumf>, %102, %cst_32 [2] : vector<2x8x8xf32> to vector<2x8xf32>
    %104 = vector.shape_cast %103 : vector<2x8xf32> to vector<2x8x1xf32>
    %105 = vector.broadcast %104 : vector<2x8x1xf32> to vector<2x8x8xf32>
    %106 = arith.subf %102, %105 : vector<2x8x8xf32>
    %107 = math.exp %106 : vector<2x8x8xf32>
    %cst_33 = arith.constant dense<0.000000e+00> : vector<2x8xf32>
    %108 = vector.multi_reduction <add>, %107, %cst_33 [2] : vector<2x8x8xf32> to vector<2x8xf32>
    %109 = vector.shape_cast %108 : vector<2x8xf32> to vector<2x8x1xf32>
    %110 = vector.broadcast %109 : vector<2x8x1xf32> to vector<2x8x8xf32>
    %111 = arith.divf %107, %110 : vector<2x8x8xf32>
    %112 = arith.truncf %111 : vector<2x8x8xf32> to vector<2x8x8xbf16>
    "tpu.trace_start"() <{level = 10 : i32, message = "bnm,bmd->bnd"}> : () -> ()
    %cst_34 = arith.constant dense<0.000000e+00> : vector<2x8x8xf32>
    %113 = tpu.matmul %112, %99, %cst_34 {dimension_numbers = #tpu.dot_dimension_numbers<[2], [1], [1], [2], [0, 0, 0, 1, 1, 2], [0], [0]>} : vector<2x8x8xbf16>, vector<2x8x8xbf16>, vector<2x8x8xf32> -> vector<2x8x8xf32>
    "tpu.trace_stop"() : () -> ()
    %114 = vector.extract_strided_slice %53 {offsets = [0, 24], sizes = [16, 8], strides = [1, 1]} : vector<16x96xbf16> to vector<16x8xbf16>
    %115 = vector.shape_cast %114 : vector<16x8xbf16> to vector<2x8x8xbf16>
    %116 = vector.extract_strided_slice %53 {offsets = [0, 56], sizes = [16, 8], strides = [1, 1]} : vector<16x96xbf16> to vector<16x8xbf16>
    %117 = vector.shape_cast %116 : vector<16x8xbf16> to vector<2x8x8xbf16>
    %118 = vector.extract_strided_slice %53 {offsets = [0, 88], sizes = [16, 8], strides = [1, 1]} : vector<16x96xbf16> to vector<16x8xbf16>
    %119 = vector.shape_cast %118 : vector<16x8xbf16> to vector<2x8x8xbf16>
    "tpu.trace_start"() <{level = 10 : i32, message = "bnd,bmd->bnm"}> : () -> ()
    %cst_35 = arith.constant dense<0.000000e+00> : vector<2x8x8xf32>
    %120 = tpu.matmul %115, %117, %cst_35 {dimension_numbers = #tpu.dot_dimension_numbers<[2], [2], [1], [1], [0, 0, 0, 1, 1, 1], [0], [0]>} : vector<2x8x8xbf16>, vector<2x8x8xbf16>, vector<2x8x8xf32> -> vector<2x8x8xf32>
    "tpu.trace_stop"() : () -> ()
    %cst_36 = arith.constant 0.353553385 : f32
    %121 = vector.broadcast %cst_36 : f32 to vector<2x8x8xf32>
    %122 = arith.mulf %120, %121 : vector<2x8x8xf32>
    %cst_37 = arith.constant dense<0xFF800000> : vector<2x8xf32>
    %123 = vector.multi_reduction <maximumf>, %122, %cst_37 [2] : vector<2x8x8xf32> to vector<2x8xf32>
    %124 = vector.shape_cast %123 : vector<2x8xf32> to vector<2x8x1xf32>
    %125 = vector.broadcast %124 : vector<2x8x1xf32> to vector<2x8x8xf32>
    %126 = arith.subf %122, %125 : vector<2x8x8xf32>
    %127 = math.exp %126 : vector<2x8x8xf32>
    %cst_38 = arith.constant dense<0.000000e+00> : vector<2x8xf32>
    %128 = vector.multi_reduction <add>, %127, %cst_38 [2] : vector<2x8x8xf32> to vector<2x8xf32>
    %129 = vector.shape_cast %128 : vector<2x8xf32> to vector<2x8x1xf32>
    %130 = vector.broadcast %129 : vector<2x8x1xf32> to vector<2x8x8xf32>
    %131 = arith.divf %127, %130 : vector<2x8x8xf32>
    %132 = arith.truncf %131 : vector<2x8x8xf32> to vector<2x8x8xbf16>
    "tpu.trace_start"() <{level = 10 : i32, message = "bnm,bmd->bnd"}> : () -> ()
    %cst_39 = arith.constant dense<0.000000e+00> : vector<2x8x8xf32>
    %133 = tpu.matmul %132, %119, %cst_39 {dimension_numbers = #tpu.dot_dimension_numbers<[2], [1], [1], [2], [0, 0, 0, 1, 1, 2], [0], [0]>} : vector<2x8x8xbf16>, vector<2x8x8xbf16>, vector<2x8x8xf32> -> vector<2x8x8xf32>
    "tpu.trace_stop"() : () -> ()
    %134 = tpu.concatenate %73, %93, %113, %133 in 2 : vector<2x8x8xf32>, vector<2x8x8xf32>, vector<2x8x8xf32>, vector<2x8x8xf32> -> vector<2x8x32xf32>
    %135 = vector.shape_cast %134 : vector<2x8x32xf32> to vector<16x32xf32>
    %136 = arith.truncf %135 : vector<16x32xf32> to vector<16x32xbf16>
    %c0_40 = arith.constant 0 : index
    %c0_41 = arith.constant 0 : index
    %c0_42 = arith.constant 0 : index
    %137 = vector.load %arg5[%c0_40, %c0_41, %c0_42] : memref<2x32x96xbf16, #tpu.memory_space<vmem>>, vector<1x32x96xbf16>
    %138 = vector.shape_cast %137 : vector<1x32x96xbf16> to vector<32x96xbf16>
    %cst_43 = arith.constant dense<0.000000e+00> : vector<16x96xf32>
    %139 = tpu.matmul %136, %138, %cst_43 {dimension_numbers = #tpu.dot_dimension_numbers<[1], [0], [0], [1], [0, 0, 1, 1], [], []>} : vector<16x32xbf16>, vector<32x96xbf16>, vector<16x96xf32> -> vector<16x96xf32>
    %140 = vector.extract_strided_slice %139 {offsets = [0, 0], sizes = [16, 32], strides = [1, 1]} : vector<16x96xf32> to vector<16x32xf32>
    %141 = vector.extract_strided_slice %139 {offsets = [0, 32], sizes = [16, 32], strides = [1, 1]} : vector<16x96xf32> to vector<16x32xf32>
    %142 = vector.extract_strided_slice %139 {offsets = [0, 64], sizes = [16, 32], strides = [1, 1]} : vector<16x96xf32> to vector<16x32xf32>
    %143 = vector.extract_strided_slice %140 {offsets = [0, 0], sizes = [15, 32], strides = [1, 1]} : vector<16x32xf32> to vector<15x32xf32>
    %144 = tpu.concatenate %21, %143 in 0 : vector<1x32xf32>, vector<15x32xf32> -> vector<16x32xf32>
    %cst_44 = arith.constant 0.000000e+00 : f32
    %145 = vector.broadcast %cst_44 : f32 to vector<16x32xf32>
    %146 = arith.select %18, %145, %144 : vector<16x32xi1>, vector<16x32xf32>
    %147 = vector.extract_strided_slice %142 {offsets = [1, 0], sizes = [15, 32], strides = [1, 1]} : vector<16x32xf32> to vector<15x32xf32>
    %148 = tpu.concatenate %147, %21 in 0 : vector<15x32xf32>, vector<1x32xf32> -> vector<16x32xf32>
    %cst_45 = arith.constant 0.000000e+00 : f32
    %149 = vector.broadcast %cst_45 : f32 to vector<16x32xf32>
    %150 = arith.select %20, %149, %148 : vector<16x32xi1>, vector<16x32xf32>
    %c0_46 = arith.constant 0 : index
    %c0_47 = arith.constant 0 : index
    %c0_48 = arith.constant 0 : index
    %151 = vector.load %arg6[%c0_46, %c0_47, %c0_48] : memref<2x1x32xf32, #tpu.memory_space<vmem>>, vector<1x1x32xf32>
    %152 = vector.shape_cast %151 : vector<1x1x32xf32> to vector<1x32xf32>
    %153 = vector.broadcast %152 : vector<1x32xf32> to vector<16x32xf32>
    %154 = arith.addf %22, %153 : vector<16x32xf32>
    %155 = arith.addf %154, %146 : vector<16x32xf32>
    %156 = arith.addf %155, %141 : vector<16x32xf32>
    %157 = arith.addf %156, %150 : vector<16x32xf32>
    %cst_49 = arith.constant dense<0.000000e+00> : vector<16xf32>
    %158 = vector.multi_reduction <add>, %157, %cst_49 [1] : vector<16x32xf32> to vector<16xf32>
    %159 = vector.shape_cast %158 : vector<16xf32> to vector<16x1xf32>
    %cst_50 = arith.constant 3.200000e+01 : f32
    %160 = vector.broadcast %cst_50 : f32 to vector<16x1xf32>
    %161 = arith.divf %159, %160 : vector<16x1xf32>
    %162 = vector.broadcast %161 : vector<16x1xf32> to vector<16x32xf32>
    %163 = arith.subf %157, %162 : vector<16x32xf32>
    %164 = arith.mulf %163, %163 : vector<16x32xf32>
    %cst_51 = arith.constant dense<0.000000e+00> : vector<16xf32>
    %165 = vector.multi_reduction <add>, %164, %cst_51 [1] : vector<16x32xf32> to vector<16xf32>
    %166 = vector.shape_cast %165 : vector<16xf32> to vector<16x1xf32>
    %cst_52 = arith.constant 3.200000e+01 : f32
    %167 = vector.broadcast %cst_52 : f32 to vector<16x1xf32>
    %168 = arith.divf %166, %167 : vector<16x1xf32>
    %169 = vector.broadcast %161 : vector<16x1xf32> to vector<16x32xf32>
    %170 = arith.subf %157, %169 : vector<16x32xf32>
    %cst_53 = arith.constant 9.99999974E-6 : f32
    %171 = vector.broadcast %cst_53 : f32 to vector<16x1xf32>
    %172 = arith.addf %168, %171 : vector<16x1xf32>
    %173 = math.rsqrt %172 : vector<16x1xf32>
    %174 = vector.broadcast %173 : vector<16x1xf32> to vector<16x32xf32>
    %175 = arith.mulf %170, %174 : vector<16x32xf32>
    %c0_54 = arith.constant 0 : index
    %c0_55 = arith.constant 0 : index
    %c0_56 = arith.constant 0 : index
    %176 = vector.load %arg7[%c0_54, %c0_55, %c0_56] : memref<2x1x32xf32, #tpu.memory_space<vmem>>, vector<1x1x32xf32>
    %177 = vector.shape_cast %176 : vector<1x1x32xf32> to vector<1x32xf32>
    %178 = vector.broadcast %177 : vector<1x32xf32> to vector<16x32xf32>
    %179 = arith.mulf %175, %178 : vector<16x32xf32>
    %c0_57 = arith.constant 0 : index
    %c0_58 = arith.constant 0 : index
    %c0_59 = arith.constant 0 : index
    %180 = vector.load %arg8[%c0_57, %c0_58, %c0_59] : memref<2x1x32xf32, #tpu.memory_space<vmem>>, vector<1x1x32xf32>
    %181 = vector.shape_cast %180 : vector<1x1x32xf32> to vector<1x32xf32>
    %182 = vector.broadcast %181 : vector<1x32xf32> to vector<16x32xf32>
    %183 = arith.addf %179, %182 : vector<16x32xf32>
    %184 = arith.truncf %183 : vector<16x32xf32> to vector<16x32xbf16>
    %c0_60 = arith.constant 0 : index
    %c0_61 = arith.constant 0 : index
    %c0_62 = arith.constant 0 : index
    %185 = vector.load %arg9[%c0_60, %c0_61, %c0_62] : memref<2x32x64xbf16, #tpu.memory_space<vmem>>, vector<1x32x64xbf16>
    %186 = vector.shape_cast %185 : vector<1x32x64xbf16> to vector<32x64xbf16>
    %cst_63 = arith.constant dense<0.000000e+00> : vector<16x64xf32>
    %187 = tpu.matmul %184, %186, %cst_63 {dimension_numbers = #tpu.dot_dimension_numbers<[1], [0], [0], [1], [0, 0, 1, 1], [], []>} : vector<16x32xbf16>, vector<32x64xbf16>, vector<16x64xf32> -> vector<16x64xf32>
    %c0_64 = arith.constant 0 : index
    %c0_65 = arith.constant 0 : index
    %c0_66 = arith.constant 0 : index
    %188 = vector.load %arg10[%c0_64, %c0_65, %c0_66] : memref<2x1x64xf32, #tpu.memory_space<vmem>>, vector<1x1x64xf32>
    %189 = vector.shape_cast %188 : vector<1x1x64xf32> to vector<1x64xf32>
    %190 = vector.broadcast %189 : vector<1x64xf32> to vector<16x64xf32>
    %191 = arith.addf %187, %190 : vector<16x64xf32>
    %cst_67 = arith.constant 0.000000e+00 : f32
    %192 = vector.broadcast %cst_67 : f32 to vector<16x64xf32>
    %193 = arith.maximumf %191, %192 : vector<16x64xf32>
    %194 = arith.truncf %193 : vector<16x64xf32> to vector<16x64xbf16>
    %c0_68 = arith.constant 0 : index
    %c0_69 = arith.constant 0 : index
    %c0_70 = arith.constant 0 : index
    %195 = vector.load %arg11[%c0_68, %c0_69, %c0_70] : memref<2x64x32xbf16, #tpu.memory_space<vmem>>, vector<1x64x32xbf16>
    %196 = vector.shape_cast %195 : vector<1x64x32xbf16> to vector<64x32xbf16>
    %cst_71 = arith.constant dense<0.000000e+00> : vector<16x32xf32>
    %197 = tpu.matmul %194, %196, %cst_71 {dimension_numbers = #tpu.dot_dimension_numbers<[1], [0], [0], [1], [0, 0, 1, 1], [], []>} : vector<16x64xbf16>, vector<64x32xbf16>, vector<16x32xf32> -> vector<16x32xf32>
    %c0_72 = arith.constant 0 : index
    %c0_73 = arith.constant 0 : index
    %c0_74 = arith.constant 0 : index
    %198 = vector.load %arg12[%c0_72, %c0_73, %c0_74] : memref<2x1x32xf32, #tpu.memory_space<vmem>>, vector<1x1x32xf32>
    %199 = vector.shape_cast %198 : vector<1x1x32xf32> to vector<1x32xf32>
    %200 = vector.broadcast %199 : vector<1x32xf32> to vector<16x32xf32>
    %201 = arith.addf %197, %200 : vector<16x32xf32>
    %202 = arith.addf %157, %201 : vector<16x32xf32>
    %cst_75 = arith.constant dense<0.000000e+00> : vector<16xf32>
    %203 = vector.multi_reduction <add>, %202, %cst_75 [1] : vector<16x32xf32> to vector<16xf32>
    %204 = vector.shape_cast %203 : vector<16xf32> to vector<16x1xf32>
    %cst_76 = arith.constant 3.200000e+01 : f32
    %205 = vector.broadcast %cst_76 : f32 to vector<16x1xf32>
    %206 = arith.divf %204, %205 : vector<16x1xf32>
    %207 = vector.broadcast %206 : vector<16x1xf32> to vector<16x32xf32>
    %208 = arith.subf %202, %207 : vector<16x32xf32>
    %209 = arith.mulf %208, %208 : vector<16x32xf32>
    %cst_77 = arith.constant dense<0.000000e+00> : vector<16xf32>
    %210 = vector.multi_reduction <add>, %209, %cst_77 [1] : vector<16x32xf32> to vector<16xf32>
    %211 = vector.shape_cast %210 : vector<16xf32> to vector<16x1xf32>
    %cst_78 = arith.constant 3.200000e+01 : f32
    %212 = vector.broadcast %cst_78 : f32 to vector<16x1xf32>
    %213 = arith.divf %211, %212 : vector<16x1xf32>
    %214 = vector.broadcast %206 : vector<16x1xf32> to vector<16x32xf32>
    %215 = arith.subf %202, %214 : vector<16x32xf32>
    %cst_79 = arith.constant 9.99999974E-6 : f32
    %216 = vector.broadcast %cst_79 : f32 to vector<16x1xf32>
    %217 = arith.addf %213, %216 : vector<16x1xf32>
    %218 = math.rsqrt %217 : vector<16x1xf32>
    %219 = vector.broadcast %218 : vector<16x1xf32> to vector<16x32xf32>
    %220 = arith.mulf %215, %219 : vector<16x32xf32>
    %c1 = arith.constant 1 : index
    %c0_80 = arith.constant 0 : index
    %c0_81 = arith.constant 0 : index
    %221 = vector.load %arg2[%c1, %c0_80, %c0_81] : memref<2x1x32xf32, #tpu.memory_space<vmem>>, vector<1x1x32xf32>
    %222 = vector.shape_cast %221 : vector<1x1x32xf32> to vector<1x32xf32>
    %223 = vector.broadcast %222 : vector<1x32xf32> to vector<16x32xf32>
    %224 = arith.mulf %220, %223 : vector<16x32xf32>
    %c1_82 = arith.constant 1 : index
    %c0_83 = arith.constant 0 : index
    %c0_84 = arith.constant 0 : index
    %225 = vector.load %arg3[%c1_82, %c0_83, %c0_84] : memref<2x1x32xf32, #tpu.memory_space<vmem>>, vector<1x1x32xf32>
    %226 = vector.shape_cast %225 : vector<1x1x32xf32> to vector<1x32xf32>
    %227 = vector.broadcast %226 : vector<1x32xf32> to vector<16x32xf32>
    %228 = arith.addf %224, %227 : vector<16x32xf32>
    %229 = arith.truncf %228 : vector<16x32xf32> to vector<16x32xbf16>
    %c1_85 = arith.constant 1 : index
    %c0_86 = arith.constant 0 : index
    %c0_87 = arith.constant 0 : index
    %230 = vector.load %arg4[%c1_85, %c0_86, %c0_87] : memref<2x32x96xbf16, #tpu.memory_space<vmem>>, vector<1x32x96xbf16>
    %231 = vector.shape_cast %230 : vector<1x32x96xbf16> to vector<32x96xbf16>
    %cst_88 = arith.constant dense<0.000000e+00> : vector<16x96xf32>
    %232 = tpu.matmul %229, %231, %cst_88 {dimension_numbers = #tpu.dot_dimension_numbers<[1], [0], [0], [1], [0, 0, 1, 1], [], []>} : vector<16x32xbf16>, vector<32x96xbf16>, vector<16x96xf32> -> vector<16x96xf32>
    %233 = arith.truncf %232 : vector<16x96xf32> to vector<16x96xbf16>
    %234 = vector.extract_strided_slice %233 {offsets = [0, 0], sizes = [16, 8], strides = [1, 1]} : vector<16x96xbf16> to vector<16x8xbf16>
    %235 = vector.shape_cast %234 : vector<16x8xbf16> to vector<2x8x8xbf16>
    %236 = vector.extract_strided_slice %233 {offsets = [0, 32], sizes = [16, 8], strides = [1, 1]} : vector<16x96xbf16> to vector<16x8xbf16>
    %237 = vector.shape_cast %236 : vector<16x8xbf16> to vector<2x8x8xbf16>
    %238 = vector.extract_strided_slice %233 {offsets = [0, 64], sizes = [16, 8], strides = [1, 1]} : vector<16x96xbf16> to vector<16x8xbf16>
    %239 = vector.shape_cast %238 : vector<16x8xbf16> to vector<2x8x8xbf16>
    "tpu.trace_start"() <{level = 10 : i32, message = "bnd,bmd->bnm"}> : () -> ()
    %cst_89 = arith.constant dense<0.000000e+00> : vector<2x8x8xf32>
    %240 = tpu.matmul %235, %237, %cst_89 {dimension_numbers = #tpu.dot_dimension_numbers<[2], [2], [1], [1], [0, 0, 0, 1, 1, 1], [0], [0]>} : vector<2x8x8xbf16>, vector<2x8x8xbf16>, vector<2x8x8xf32> -> vector<2x8x8xf32>
    "tpu.trace_stop"() : () -> ()
    %cst_90 = arith.constant 0.353553385 : f32
    %241 = vector.broadcast %cst_90 : f32 to vector<2x8x8xf32>
    %242 = arith.mulf %240, %241 : vector<2x8x8xf32>
    %cst_91 = arith.constant dense<0xFF800000> : vector<2x8xf32>
    %243 = vector.multi_reduction <maximumf>, %242, %cst_91 [2] : vector<2x8x8xf32> to vector<2x8xf32>
    %244 = vector.shape_cast %243 : vector<2x8xf32> to vector<2x8x1xf32>
    %245 = vector.broadcast %244 : vector<2x8x1xf32> to vector<2x8x8xf32>
    %246 = arith.subf %242, %245 : vector<2x8x8xf32>
    %247 = math.exp %246 : vector<2x8x8xf32>
    %cst_92 = arith.constant dense<0.000000e+00> : vector<2x8xf32>
    %248 = vector.multi_reduction <add>, %247, %cst_92 [2] : vector<2x8x8xf32> to vector<2x8xf32>
    %249 = vector.shape_cast %248 : vector<2x8xf32> to vector<2x8x1xf32>
    %250 = vector.broadcast %249 : vector<2x8x1xf32> to vector<2x8x8xf32>
    %251 = arith.divf %247, %250 : vector<2x8x8xf32>
    %252 = arith.truncf %251 : vector<2x8x8xf32> to vector<2x8x8xbf16>
    "tpu.trace_start"() <{level = 10 : i32, message = "bnm,bmd->bnd"}> : () -> ()
    %cst_93 = arith.constant dense<0.000000e+00> : vector<2x8x8xf32>
    %253 = tpu.matmul %252, %239, %cst_93 {dimension_numbers = #tpu.dot_dimension_numbers<[2], [1], [1], [2], [0, 0, 0, 1, 1, 2], [0], [0]>} : vector<2x8x8xbf16>, vector<2x8x8xbf16>, vector<2x8x8xf32> -> vector<2x8x8xf32>
    "tpu.trace_stop"() : () -> ()
    %254 = vector.extract_strided_slice %233 {offsets = [0, 8], sizes = [16, 8], strides = [1, 1]} : vector<16x96xbf16> to vector<16x8xbf16>
    %255 = vector.shape_cast %254 : vector<16x8xbf16> to vector<2x8x8xbf16>
    %256 = vector.extract_strided_slice %233 {offsets = [0, 40], sizes = [16, 8], strides = [1, 1]} : vector<16x96xbf16> to vector<16x8xbf16>
    %257 = vector.shape_cast %256 : vector<16x8xbf16> to vector<2x8x8xbf16>
    %258 = vector.extract_strided_slice %233 {offsets = [0, 72], sizes = [16, 8], strides = [1, 1]} : vector<16x96xbf16> to vector<16x8xbf16>
    %259 = vector.shape_cast %258 : vector<16x8xbf16> to vector<2x8x8xbf16>
    "tpu.trace_start"() <{level = 10 : i32, message = "bnd,bmd->bnm"}> : () -> ()
    %cst_94 = arith.constant dense<0.000000e+00> : vector<2x8x8xf32>
    %260 = tpu.matmul %255, %257, %cst_94 {dimension_numbers = #tpu.dot_dimension_numbers<[2], [2], [1], [1], [0, 0, 0, 1, 1, 1], [0], [0]>} : vector<2x8x8xbf16>, vector<2x8x8xbf16>, vector<2x8x8xf32> -> vector<2x8x8xf32>
    "tpu.trace_stop"() : () -> ()
    %cst_95 = arith.constant 0.353553385 : f32
    %261 = vector.broadcast %cst_95 : f32 to vector<2x8x8xf32>
    %262 = arith.mulf %260, %261 : vector<2x8x8xf32>
    %cst_96 = arith.constant dense<0xFF800000> : vector<2x8xf32>
    %263 = vector.multi_reduction <maximumf>, %262, %cst_96 [2] : vector<2x8x8xf32> to vector<2x8xf32>
    %264 = vector.shape_cast %263 : vector<2x8xf32> to vector<2x8x1xf32>
    %265 = vector.broadcast %264 : vector<2x8x1xf32> to vector<2x8x8xf32>
    %266 = arith.subf %262, %265 : vector<2x8x8xf32>
    %267 = math.exp %266 : vector<2x8x8xf32>
    %cst_97 = arith.constant dense<0.000000e+00> : vector<2x8xf32>
    %268 = vector.multi_reduction <add>, %267, %cst_97 [2] : vector<2x8x8xf32> to vector<2x8xf32>
    %269 = vector.shape_cast %268 : vector<2x8xf32> to vector<2x8x1xf32>
    %270 = vector.broadcast %269 : vector<2x8x1xf32> to vector<2x8x8xf32>
    %271 = arith.divf %267, %270 : vector<2x8x8xf32>
    %272 = arith.truncf %271 : vector<2x8x8xf32> to vector<2x8x8xbf16>
    "tpu.trace_start"() <{level = 10 : i32, message = "bnm,bmd->bnd"}> : () -> ()
    %cst_98 = arith.constant dense<0.000000e+00> : vector<2x8x8xf32>
    %273 = tpu.matmul %272, %259, %cst_98 {dimension_numbers = #tpu.dot_dimension_numbers<[2], [1], [1], [2], [0, 0, 0, 1, 1, 2], [0], [0]>} : vector<2x8x8xbf16>, vector<2x8x8xbf16>, vector<2x8x8xf32> -> vector<2x8x8xf32>
    "tpu.trace_stop"() : () -> ()
    %274 = vector.extract_strided_slice %233 {offsets = [0, 16], sizes = [16, 8], strides = [1, 1]} : vector<16x96xbf16> to vector<16x8xbf16>
    %275 = vector.shape_cast %274 : vector<16x8xbf16> to vector<2x8x8xbf16>
    %276 = vector.extract_strided_slice %233 {offsets = [0, 48], sizes = [16, 8], strides = [1, 1]} : vector<16x96xbf16> to vector<16x8xbf16>
    %277 = vector.shape_cast %276 : vector<16x8xbf16> to vector<2x8x8xbf16>
    %278 = vector.extract_strided_slice %233 {offsets = [0, 80], sizes = [16, 8], strides = [1, 1]} : vector<16x96xbf16> to vector<16x8xbf16>
    %279 = vector.shape_cast %278 : vector<16x8xbf16> to vector<2x8x8xbf16>
    "tpu.trace_start"() <{level = 10 : i32, message = "bnd,bmd->bnm"}> : () -> ()
    %cst_99 = arith.constant dense<0.000000e+00> : vector<2x8x8xf32>
    %280 = tpu.matmul %275, %277, %cst_99 {dimension_numbers = #tpu.dot_dimension_numbers<[2], [2], [1], [1], [0, 0, 0, 1, 1, 1], [0], [0]>} : vector<2x8x8xbf16>, vector<2x8x8xbf16>, vector<2x8x8xf32> -> vector<2x8x8xf32>
    "tpu.trace_stop"() : () -> ()
    %cst_100 = arith.constant 0.353553385 : f32
    %281 = vector.broadcast %cst_100 : f32 to vector<2x8x8xf32>
    %282 = arith.mulf %280, %281 : vector<2x8x8xf32>
    %cst_101 = arith.constant dense<0xFF800000> : vector<2x8xf32>
    %283 = vector.multi_reduction <maximumf>, %282, %cst_101 [2] : vector<2x8x8xf32> to vector<2x8xf32>
    %284 = vector.shape_cast %283 : vector<2x8xf32> to vector<2x8x1xf32>
    %285 = vector.broadcast %284 : vector<2x8x1xf32> to vector<2x8x8xf32>
    %286 = arith.subf %282, %285 : vector<2x8x8xf32>
    %287 = math.exp %286 : vector<2x8x8xf32>
    %cst_102 = arith.constant dense<0.000000e+00> : vector<2x8xf32>
    %288 = vector.multi_reduction <add>, %287, %cst_102 [2] : vector<2x8x8xf32> to vector<2x8xf32>
    %289 = vector.shape_cast %288 : vector<2x8xf32> to vector<2x8x1xf32>
    %290 = vector.broadcast %289 : vector<2x8x1xf32> to vector<2x8x8xf32>
    %291 = arith.divf %287, %290 : vector<2x8x8xf32>
    %292 = arith.truncf %291 : vector<2x8x8xf32> to vector<2x8x8xbf16>
    "tpu.trace_start"() <{level = 10 : i32, message = "bnm,bmd->bnd"}> : () -> ()
    %cst_103 = arith.constant dense<0.000000e+00> : vector<2x8x8xf32>
    %293 = tpu.matmul %292, %279, %cst_103 {dimension_numbers = #tpu.dot_dimension_numbers<[2], [1], [1], [2], [0, 0, 0, 1, 1, 2], [0], [0]>} : vector<2x8x8xbf16>, vector<2x8x8xbf16>, vector<2x8x8xf32> -> vector<2x8x8xf32>
    "tpu.trace_stop"() : () -> ()
    %294 = vector.extract_strided_slice %233 {offsets = [0, 24], sizes = [16, 8], strides = [1, 1]} : vector<16x96xbf16> to vector<16x8xbf16>
    %295 = vector.shape_cast %294 : vector<16x8xbf16> to vector<2x8x8xbf16>
    %296 = vector.extract_strided_slice %233 {offsets = [0, 56], sizes = [16, 8], strides = [1, 1]} : vector<16x96xbf16> to vector<16x8xbf16>
    %297 = vector.shape_cast %296 : vector<16x8xbf16> to vector<2x8x8xbf16>
    %298 = vector.extract_strided_slice %233 {offsets = [0, 88], sizes = [16, 8], strides = [1, 1]} : vector<16x96xbf16> to vector<16x8xbf16>
    %299 = vector.shape_cast %298 : vector<16x8xbf16> to vector<2x8x8xbf16>
    "tpu.trace_start"() <{level = 10 : i32, message = "bnd,bmd->bnm"}> : () -> ()
    %cst_104 = arith.constant dense<0.000000e+00> : vector<2x8x8xf32>
    %300 = tpu.matmul %295, %297, %cst_104 {dimension_numbers = #tpu.dot_dimension_numbers<[2], [2], [1], [1], [0, 0, 0, 1, 1, 1], [0], [0]>} : vector<2x8x8xbf16>, vector<2x8x8xbf16>, vector<2x8x8xf32> -> vector<2x8x8xf32>
    "tpu.trace_stop"() : () -> ()
    %cst_105 = arith.constant 0.353553385 : f32
    %301 = vector.broadcast %cst_105 : f32 to vector<2x8x8xf32>
    %302 = arith.mulf %300, %301 : vector<2x8x8xf32>
    %cst_106 = arith.constant dense<0xFF800000> : vector<2x8xf32>
    %303 = vector.multi_reduction <maximumf>, %302, %cst_106 [2] : vector<2x8x8xf32> to vector<2x8xf32>
    %304 = vector.shape_cast %303 : vector<2x8xf32> to vector<2x8x1xf32>
    %305 = vector.broadcast %304 : vector<2x8x1xf32> to vector<2x8x8xf32>
    %306 = arith.subf %302, %305 : vector<2x8x8xf32>
    %307 = math.exp %306 : vector<2x8x8xf32>
    %cst_107 = arith.constant dense<0.000000e+00> : vector<2x8xf32>
    %308 = vector.multi_reduction <add>, %307, %cst_107 [2] : vector<2x8x8xf32> to vector<2x8xf32>
    %309 = vector.shape_cast %308 : vector<2x8xf32> to vector<2x8x1xf32>
    %310 = vector.broadcast %309 : vector<2x8x1xf32> to vector<2x8x8xf32>
    %311 = arith.divf %307, %310 : vector<2x8x8xf32>
    %312 = arith.truncf %311 : vector<2x8x8xf32> to vector<2x8x8xbf16>
    "tpu.trace_start"() <{level = 10 : i32, message = "bnm,bmd->bnd"}> : () -> ()
    %cst_108 = arith.constant dense<0.000000e+00> : vector<2x8x8xf32>
    %313 = tpu.matmul %312, %299, %cst_108 {dimension_numbers = #tpu.dot_dimension_numbers<[2], [1], [1], [2], [0, 0, 0, 1, 1, 2], [0], [0]>} : vector<2x8x8xbf16>, vector<2x8x8xbf16>, vector<2x8x8xf32> -> vector<2x8x8xf32>
    "tpu.trace_stop"() : () -> ()
    %314 = tpu.concatenate %253, %273, %293, %313 in 2 : vector<2x8x8xf32>, vector<2x8x8xf32>, vector<2x8x8xf32>, vector<2x8x8xf32> -> vector<2x8x32xf32>
    %315 = vector.shape_cast %314 : vector<2x8x32xf32> to vector<16x32xf32>
    %316 = arith.truncf %315 : vector<16x32xf32> to vector<16x32xbf16>
    %c1_109 = arith.constant 1 : index
    %c0_110 = arith.constant 0 : index
    %c0_111 = arith.constant 0 : index
    %317 = vector.load %arg5[%c1_109, %c0_110, %c0_111] : memref<2x32x96xbf16, #tpu.memory_space<vmem>>, vector<1x32x96xbf16>
    %318 = vector.shape_cast %317 : vector<1x32x96xbf16> to vector<32x96xbf16>
    %cst_112 = arith.constant dense<0.000000e+00> : vector<16x96xf32>
    %319 = tpu.matmul %316, %318, %cst_112 {dimension_numbers = #tpu.dot_dimension_numbers<[1], [0], [0], [1], [0, 0, 1, 1], [], []>} : vector<16x32xbf16>, vector<32x96xbf16>, vector<16x96xf32> -> vector<16x96xf32>
    %320 = vector.extract_strided_slice %319 {offsets = [0, 0], sizes = [16, 32], strides = [1, 1]} : vector<16x96xf32> to vector<16x32xf32>
    %321 = vector.extract_strided_slice %319 {offsets = [0, 32], sizes = [16, 32], strides = [1, 1]} : vector<16x96xf32> to vector<16x32xf32>
    %322 = vector.extract_strided_slice %319 {offsets = [0, 64], sizes = [16, 32], strides = [1, 1]} : vector<16x96xf32> to vector<16x32xf32>
    %323 = vector.extract_strided_slice %320 {offsets = [0, 0], sizes = [15, 32], strides = [1, 1]} : vector<16x32xf32> to vector<15x32xf32>
    %324 = tpu.concatenate %21, %323 in 0 : vector<1x32xf32>, vector<15x32xf32> -> vector<16x32xf32>
    %cst_113 = arith.constant 0.000000e+00 : f32
    %325 = vector.broadcast %cst_113 : f32 to vector<16x32xf32>
    %326 = arith.select %18, %325, %324 : vector<16x32xi1>, vector<16x32xf32>
    %327 = vector.extract_strided_slice %322 {offsets = [1, 0], sizes = [15, 32], strides = [1, 1]} : vector<16x32xf32> to vector<15x32xf32>
    %328 = tpu.concatenate %327, %21 in 0 : vector<15x32xf32>, vector<1x32xf32> -> vector<16x32xf32>
    %cst_114 = arith.constant 0.000000e+00 : f32
    %329 = vector.broadcast %cst_114 : f32 to vector<16x32xf32>
    %330 = arith.select %20, %329, %328 : vector<16x32xi1>, vector<16x32xf32>
    %c1_115 = arith.constant 1 : index
    %c0_116 = arith.constant 0 : index
    %c0_117 = arith.constant 0 : index
    %331 = vector.load %arg6[%c1_115, %c0_116, %c0_117] : memref<2x1x32xf32, #tpu.memory_space<vmem>>, vector<1x1x32xf32>
    %332 = vector.shape_cast %331 : vector<1x1x32xf32> to vector<1x32xf32>
    %333 = vector.broadcast %332 : vector<1x32xf32> to vector<16x32xf32>
    %334 = arith.addf %202, %333 : vector<16x32xf32>
    %335 = arith.addf %334, %326 : vector<16x32xf32>
    %336 = arith.addf %335, %321 : vector<16x32xf32>
    %337 = arith.addf %336, %330 : vector<16x32xf32>
    %cst_118 = arith.constant dense<0.000000e+00> : vector<16xf32>
    %338 = vector.multi_reduction <add>, %337, %cst_118 [1] : vector<16x32xf32> to vector<16xf32>
    %339 = vector.shape_cast %338 : vector<16xf32> to vector<16x1xf32>
    %cst_119 = arith.constant 3.200000e+01 : f32
    %340 = vector.broadcast %cst_119 : f32 to vector<16x1xf32>
    %341 = arith.divf %339, %340 : vector<16x1xf32>
    %342 = vector.broadcast %341 : vector<16x1xf32> to vector<16x32xf32>
    %343 = arith.subf %337, %342 : vector<16x32xf32>
    %344 = arith.mulf %343, %343 : vector<16x32xf32>
    %cst_120 = arith.constant dense<0.000000e+00> : vector<16xf32>
    %345 = vector.multi_reduction <add>, %344, %cst_120 [1] : vector<16x32xf32> to vector<16xf32>
    %346 = vector.shape_cast %345 : vector<16xf32> to vector<16x1xf32>
    %cst_121 = arith.constant 3.200000e+01 : f32
    %347 = vector.broadcast %cst_121 : f32 to vector<16x1xf32>
    %348 = arith.divf %346, %347 : vector<16x1xf32>
    %349 = vector.broadcast %341 : vector<16x1xf32> to vector<16x32xf32>
    %350 = arith.subf %337, %349 : vector<16x32xf32>
    %cst_122 = arith.constant 9.99999974E-6 : f32
    %351 = vector.broadcast %cst_122 : f32 to vector<16x1xf32>
    %352 = arith.addf %348, %351 : vector<16x1xf32>
    %353 = math.rsqrt %352 : vector<16x1xf32>
    %354 = vector.broadcast %353 : vector<16x1xf32> to vector<16x32xf32>
    %355 = arith.mulf %350, %354 : vector<16x32xf32>
    %c1_123 = arith.constant 1 : index
    %c0_124 = arith.constant 0 : index
    %c0_125 = arith.constant 0 : index
    %356 = vector.load %arg7[%c1_123, %c0_124, %c0_125] : memref<2x1x32xf32, #tpu.memory_space<vmem>>, vector<1x1x32xf32>
    %357 = vector.shape_cast %356 : vector<1x1x32xf32> to vector<1x32xf32>
    %358 = vector.broadcast %357 : vector<1x32xf32> to vector<16x32xf32>
    %359 = arith.mulf %355, %358 : vector<16x32xf32>
    %c1_126 = arith.constant 1 : index
    %c0_127 = arith.constant 0 : index
    %c0_128 = arith.constant 0 : index
    %360 = vector.load %arg8[%c1_126, %c0_127, %c0_128] : memref<2x1x32xf32, #tpu.memory_space<vmem>>, vector<1x1x32xf32>
    %361 = vector.shape_cast %360 : vector<1x1x32xf32> to vector<1x32xf32>
    %362 = vector.broadcast %361 : vector<1x32xf32> to vector<16x32xf32>
    %363 = arith.addf %359, %362 : vector<16x32xf32>
    %364 = arith.truncf %363 : vector<16x32xf32> to vector<16x32xbf16>
    %c1_129 = arith.constant 1 : index
    %c0_130 = arith.constant 0 : index
    %c0_131 = arith.constant 0 : index
    %365 = vector.load %arg9[%c1_129, %c0_130, %c0_131] : memref<2x32x64xbf16, #tpu.memory_space<vmem>>, vector<1x32x64xbf16>
    %366 = vector.shape_cast %365 : vector<1x32x64xbf16> to vector<32x64xbf16>
    %cst_132 = arith.constant dense<0.000000e+00> : vector<16x64xf32>
    %367 = tpu.matmul %364, %366, %cst_132 {dimension_numbers = #tpu.dot_dimension_numbers<[1], [0], [0], [1], [0, 0, 1, 1], [], []>} : vector<16x32xbf16>, vector<32x64xbf16>, vector<16x64xf32> -> vector<16x64xf32>
    %c1_133 = arith.constant 1 : index
    %c0_134 = arith.constant 0 : index
    %c0_135 = arith.constant 0 : index
    %368 = vector.load %arg10[%c1_133, %c0_134, %c0_135] : memref<2x1x64xf32, #tpu.memory_space<vmem>>, vector<1x1x64xf32>
    %369 = vector.shape_cast %368 : vector<1x1x64xf32> to vector<1x64xf32>
    %370 = vector.broadcast %369 : vector<1x64xf32> to vector<16x64xf32>
    %371 = arith.addf %367, %370 : vector<16x64xf32>
    %cst_136 = arith.constant 0.000000e+00 : f32
    %372 = vector.broadcast %cst_136 : f32 to vector<16x64xf32>
    %373 = arith.maximumf %371, %372 : vector<16x64xf32>
    %374 = arith.truncf %373 : vector<16x64xf32> to vector<16x64xbf16>
    %c1_137 = arith.constant 1 : index
    %c0_138 = arith.constant 0 : index
    %c0_139 = arith.constant 0 : index
    %375 = vector.load %arg11[%c1_137, %c0_138, %c0_139] : memref<2x64x32xbf16, #tpu.memory_space<vmem>>, vector<1x64x32xbf16>
    %376 = vector.shape_cast %375 : vector<1x64x32xbf16> to vector<64x32xbf16>
    %cst_140 = arith.constant dense<0.000000e+00> : vector<16x32xf32>
    %377 = tpu.matmul %374, %376, %cst_140 {dimension_numbers = #tpu.dot_dimension_numbers<[1], [0], [0], [1], [0, 0, 1, 1], [], []>} : vector<16x64xbf16>, vector<64x32xbf16>, vector<16x32xf32> -> vector<16x32xf32>
    %c1_141 = arith.constant 1 : index
    %c0_142 = arith.constant 0 : index
    %c0_143 = arith.constant 0 : index
    %378 = vector.load %arg12[%c1_141, %c0_142, %c0_143] : memref<2x1x32xf32, #tpu.memory_space<vmem>>, vector<1x1x32xf32>
    %379 = vector.shape_cast %378 : vector<1x1x32xf32> to vector<1x32xf32>
    %380 = vector.broadcast %379 : vector<1x32xf32> to vector<16x32xf32>
    %381 = arith.addf %377, %380 : vector<16x32xf32>
    %382 = arith.addf %337, %381 : vector<16x32xf32>
    %c0_144 = arith.constant 0 : index
    %c0_145 = arith.constant 0 : index
    %383 = vector.load %arg13[%c0_144, %c0_145] : memref<16x32xf32, #tpu.memory_space<vmem>>, vector<16x32xf32>
    tpu.vector_store %arg13[%c0_144, %c0_145], %382 {strides = array<i32>} : memref<16x32xf32, #tpu.memory_space<vmem>>, vector<16x32xf32>,
    return
  }
  func.func @transform_0(%arg0: i32) -> (i32, i32) {
    %c0_i32 = arith.constant 0 : i32
    %c0_i32_0 = arith.constant 0 : i32
    return %arg0, %c0_i32 : i32, i32
  }
  func.func @transform_1(%arg0: i32) -> (i32, i32, i32) {
    %c0_i32 = arith.constant 0 : i32
    %c0_i32_0 = arith.constant 0 : i32
    %c0_i32_1 = arith.constant 0 : i32
    %c0_i32_2 = arith.constant 0 : i32
    return %c0_i32, %c0_i32_0, %c0_i32_1 : i32, i32, i32
  }
  func.func @transform_2(%arg0: i32) -> (i32, i32, i32) {
    %c0_i32 = arith.constant 0 : i32
    %c0_i32_0 = arith.constant 0 : i32
    %c0_i32_1 = arith.constant 0 : i32
    %c0_i32_2 = arith.constant 0 : i32
    return %c0_i32, %c0_i32_0, %c0_i32_1 : i32, i32, i32
  }
  func.func @transform_3(%arg0: i32) -> (i32, i32, i32) {
    %c0_i32 = arith.constant 0 : i32
    %c0_i32_0 = arith.constant 0 : i32
    %c0_i32_1 = arith.constant 0 : i32
    %c0_i32_2 = arith.constant 0 : i32
    return %c0_i32, %c0_i32_0, %c0_i32_1 : i32, i32, i32
  }
  func.func @transform_4(%arg0: i32) -> (i32, i32, i32) {
    %c0_i32 = arith.constant 0 : i32
    %c0_i32_0 = arith.constant 0 : i32
    %c0_i32_1 = arith.constant 0 : i32
    %c0_i32_2 = arith.constant 0 : i32
    return %c0_i32, %c0_i32_0, %c0_i32_1 : i32, i32, i32
  }
  func.func @transform_5(%arg0: i32) -> (i32, i32, i32) {
    %c0_i32 = arith.constant 0 : i32
    %c0_i32_0 = arith.constant 0 : i32
    %c0_i32_1 = arith.constant 0 : i32
    %c0_i32_2 = arith.constant 0 : i32
    return %c0_i32, %c0_i32_0, %c0_i32_1 : i32, i32, i32
  }
  func.func @transform_6(%arg0: i32) -> (i32, i32, i32) {
    %c0_i32 = arith.constant 0 : i32
    %c0_i32_0 = arith.constant 0 : i32
    %c0_i32_1 = arith.constant 0 : i32
    %c0_i32_2 = arith.constant 0 : i32
    return %c0_i32, %c0_i32_0, %c0_i32_1 : i32, i32, i32
  }
  func.func @transform_7(%arg0: i32) -> (i32, i32, i32) {
    %c0_i32 = arith.constant 0 : i32
    %c0_i32_0 = arith.constant 0 : i32
    %c0_i32_1 = arith.constant 0 : i32
    %c0_i32_2 = arith.constant 0 : i32
    return %c0_i32, %c0_i32_0, %c0_i32_1 : i32, i32, i32
  }
  func.func @transform_8(%arg0: i32) -> (i32, i32, i32) {
    %c0_i32 = arith.constant 0 : i32
    %c0_i32_0 = arith.constant 0 : i32
    %c0_i32_1 = arith.constant 0 : i32
    %c0_i32_2 = arith.constant 0 : i32
    return %c0_i32, %c0_i32_0, %c0_i32_1 : i32, i32, i32
  }
  func.func @transform_9(%arg0: i32) -> (i32, i32, i32) {
    %c0_i32 = arith.constant 0 : i32
    %c0_i32_0 = arith.constant 0 : i32
    %c0_i32_1 = arith.constant 0 : i32
    %c0_i32_2 = arith.constant 0 : i32
    return %c0_i32, %c0_i32_0, %c0_i32_1 : i32, i32, i32
  }
  func.func @transform_10(%arg0: i32) -> (i32, i32, i32) {
    %c0_i32 = arith.constant 0 : i32
    %c0_i32_0 = arith.constant 0 : i32
    %c0_i32_1 = arith.constant 0 : i32
    %c0_i32_2 = arith.constant 0 : i32
    return %c0_i32, %c0_i32_0, %c0_i32_1 : i32, i32, i32
  }
  func.func @transform_11(%arg0: i32) -> (i32, i32, i32) {
    %c0_i32 = arith.constant 0 : i32
    %c0_i32_0 = arith.constant 0 : i32
    %c0_i32_1 = arith.constant 0 : i32
    %c0_i32_2 = arith.constant 0 : i32
    return %c0_i32, %c0_i32_0, %c0_i32_1 : i32, i32, i32
  }
  func.func @transform_12(%arg0: i32) -> (i32, i32) {
    %c0_i32 = arith.constant 0 : i32
    %c0_i32_0 = arith.constant 0 : i32
    return %arg0, %c0_i32 : i32, i32
  }
}

</mosaic_0001>

<bundles_post_ra>
// kernel: temporal_transformer.1
= control target key start
LH: loop header
LB: loop body
LE: loop exit
PB: predicated region body
PF: predicated region fallthrough
CT: control target
= control target key end

     0   :  { %vm2940_vm0 = vcmask 261120   ;;  %s2918_s0 = inlined_call_operand.vmem [shape: f32[16,32], index: 0, kind: input, shape index: {}]   ;;  %s2919_s1 = inlined_call_operand.vmem [shape: f32[2,1,32], index: 1, kind: input, shape index: {}]   ;;  %s2920_s2 = inlined_call_operand.vmem [shape: f32[2,1,32], index: 2, kind: input, shape index: {}]   ;;  %s2921_s3 = inlined_call_operand.vmem [shape: bf16[2,32,96], index: 3, kind: input, shape index: {}]   ;;  %s2922_s4 = inlined_call_operand.vmem [shape: bf16[2,32,96], index: 4, kind: input, shape index: {}]   ;;  %s2923_s5 = inlined_call_operand.vmem [shape: f32[2,1,32], index: 5, kind: input, shape index: {}]   ;;  %s2924_s6 = inlined_call_operand.vmem [shape: f32[2,1,32], index: 6, kind: input, shape index: {}]   ;;  %s2925_s7 = inlined_call_operand.vmem [shape: f32[2,1,32], index: 7, kind: input, shape index: {}]   ;;  %s2926_s8 = inlined_call_operand.vmem [shape: bf16[2,32,64], index: 8, kind: input, shape index: {}]   ;;  %s2927_s9 = inlined_call_operand.vmem [shape: f32[2,1,64], index: 9, kind: input, shape index: {}]   ;;  %s2928_s10 = inlined_call_operand.vmem [shape: bf16[2,64,32], index: 10, kind: input, shape index: {}]   ;;  %s2929_s11 = inlined_call_operand.vmem [shape: f32[2,1,32], index: 11, kind: input, shape index: {}]   ;;  %s2930_s12 = inlined_call_operand.hbm [shape: f32[16,32], index: 12, kind: output, shape index: {}]  }
   0x1   :  { %v74_v0 = vld [vmem:[%s2918_s0] sm:$0xff]  ;;  %v2376_v2 = vld [vmem:[%s2918_s0 + $0x8] sm:$0xff] }
   0x2   :  { %v77_v1 = vsel %vm2940_vm0, %v74_v0, 0.0 }
   0x3   :  { %78 = vadd.xlane.f32.xlu0 %v77_v1 }
   0x4   :  { %17 = vsyncpa [#allocation3], 0  ;;  %v80_v3 = vsel %vm2940_vm0, %v2376_v2, 0.0  ;;  %v2287_v4 = vmov 32.0   ;;  %v2098_v21 = vld [vmem:[%s2921_s3 + $0x8] sm:$0xff]  ;;  %v2097_v23 = vld [vmem:[%s2921_s3] sm:$0xff] }
   0x5   :  { %2178 = vrcp.f32 %v2287_v4  ;;  %166 = vmatpush.bf16.msra.mxu0 %v2098_v21  ;;  %v2165_v42 = vld [vmem:[%s2919_s1] ss:$0 sm:$0xff]  ;;  %s2288_s15 = smov 88   ;;  %s2289_s16 = smov 96   ;;  %vm181_vm8 = vcmask 64512   ;;  %vm282_vm9 = vcmask 1043456  }
   0x6   :  { %v2166_v47 = vld [vmem:[%s2920_s2] ss:$0 sm:$0xff]  ;;  %s2290_s17 = smov 80   ;;  %s2291_s18 = smov 72  }
   0x7   :  { %s2292_s19 = smov 112   ;;  %s2293_s20 = smov 120  }
   0x8   :  { %s2294_s21 = smov 104   ;;  %s2295_s22 = smov 64  }
   0x9   :  { %167 = vmatpush.bf16.msra.mxu0 %v2097_v23  ;;  %s2296_s23 = smov 56   ;;  %s2297_s24 = smov 40  }
   0xa   :  { %s2936_s25 = smov 48   ;;  %s2934_s26 = smov 8  }
   0xb   :  { %81 = vadd.xlane.f32.xlu0 %v80_v3  ;;  %v2179_v5 = vpop.eup %2178  ;;  %s2933_s27 = smov 16   ;;  %s2932_s28 = smov 24  }
   0xc   :  { %v84_v6 = vmul.f32 32.0, %v2179_v5  ;;  %vm88_vm1 = vweird.f32 %v2179_v5 }
   0xe   :  { %v85_v7 = vsub.f32 1.0, %v84_v6 }
  0x10   :  { %v86_v8 = vmul.f32 %v2179_v5, %v85_v7 }
  0x12   :  { %v87_v9 = vadd.f32 %v2179_v5, %v86_v8 }
  0x14   :  { %v2380_v10 = vsel %vm88_vm1, %v2179_v5, %v87_v9 }
  0x76   :  { %v79_v11 = vpop.xlane.xlu0 %78 }
  0x77   :  { %v90_v12 = vmul.f32 %v2380_v10, %v79_v11 }
  0x79   :  { %v92_v13 = vsub.f32 %v74_v0, %v90_v12 }
  0x7b   :  { %v94_v14 = vmul.f32 %v92_v13, %v92_v13 }
  0x7d   :  { %v96_v15 = vsel %vm2940_vm0, %v94_v14, 0.0 }
  0x7e   :  { %97 = vadd.xlane.f32.xlu1 %v96_v15  ;;  %v82_v16 = vpop.xlane.xlu0 %81 }
  0x7f   :  { %v91_v17 = vmul.f32 %v2380_v10, %v82_v16 }
  0x81   :  { %v93_v18 = vsub.f32 %v2376_v2, %v91_v17 }
  0x83   :  { %v95_v19 = vmul.f32 %v93_v18, %v93_v18 }
  0x85   :  { %v99_v20 = vsel %vm2940_vm0, %v95_v19, 0.0 }
  0x86   :  { %100 = vadd.xlane.f32.xlu1 %v99_v20 }
  0xf1   :  { %v98_v22 = vpop.xlane.xlu1 %97 }
  0xf2   :  { %v102_v24 = vmul.f32 %v98_v22, %v2380_v10 }
  0xf4   :  { %v104_v25 = vadd.f32 1e-05, %v102_v24 }
  0xf6   :  { %2180 = vrsqrt.f32 %v104_v25  ;;  %vm112_vm3 = vweird.f32 %v104_v25 }
  0xf9   :  { %v101_v26 = vpop.xlane.xlu1 %100 }
  0xfa   :  { %v103_v27 = vmul.f32 %v101_v26, %v2380_v10 }
  0xfc   :  { %v2181_v28 = vpop.eup %2180  ;;  %v105_v29 = vadd.f32 1e-05, %v103_v27 }
  0xfd   :  { %v107_v30 = vmul.f32 %v2181_v28, %v104_v25  ;;  %vm113_vm2 = vweird.f32 %v2181_v28 }
  0xfe   :  { %2182 = vrsqrt.f32 %v105_v29  ;;  %vm114_vm4 = vmor %vm112_vm3, %vm113_vm2  ;;  %vm122_vm6 = vweird.f32 %v105_v29 }
  0xff   :  { %v108_v31 = vmul.f32 %v2181_v28, %v107_v30 }
 0x101   :  { %v109_v32 = vmul.f32 0.5, %v108_v31 }
 0x103   :  { %v110_v33 = vsub.f32 1.5, %v109_v32 }
 0x104   :  { %v2183_v34 = vpop.eup %2182 }
 0x105   :  { %v111_v35 = vmul.f32 %v2181_v28, %v110_v33  ;;  %v117_v36 = vmul.f32 %v2183_v34, %v105_v29  ;;  %vm123_vm5 = vweird.f32 %v2183_v34 }
 0x106   :  { %vm124_vm7 = vmor %vm122_vm6, %vm123_vm5 }
 0x107   :  { %v118_v37 = vmul.f32 %v2183_v34, %v117_v36  ;;  %v115_v38 = vsel %vm114_vm4, %v2181_v28, %v111_v35 }
 0x108   :  { %v126_v41 = vmul.f32 %v115_v38, %v92_v13 }
 0x109   :  { %v119_v39 = vmul.f32 0.5, %v118_v37 }
 0x10a   :  { %v132_v46 = vmul.f32 %v2165_v42, %v126_v41 }
 0x10b   :  { %v120_v40 = vsub.f32 1.5, %v119_v39 }
 0x10c   :  { %v138_v49 = vadd.f32 %v2166_v47, %v132_v46 }
 0x10d   :  { %v121_v43 = vmul.f32 %v2183_v34, %v120_v40 }
 0x10f   :  { %v125_v44 = vsel %vm124_vm7, %v2183_v34, %v121_v43 }
 0x110   :  { %v127_v45 = vmul.f32 %v125_v44, %v93_v18 }
 0x112   :  { %v133_v48 = vmul.f32 %v2165_v42, %v127_v45 }
 0x114   :  { %v139_v50 = vadd.f32 %v2166_v47, %v133_v48 }
 0x116   :  { %v140_v51 = vpack.c.bf16 %v139_v50, %v138_v49 }
 0x118   :  { %1958 = vmatmul.msk.bf16.vlgmr.msra.gmra.mxu0 %vm2940_vm0, %v140_v51 }
 0x195   :  { %v169_v52 = vpop.f32.mrf.mxu0 }
 0x196   :  { %v174_v53 = vpack.c.bf16 %v169_v52, %v169_v52 }
 0x198   :  { %v177_v54 = vunpack.c.l.b16 %v174_v53 }
 0x19a   :  { %v2402_v55 = vpack.c.b16 %v177_v54, %v177_v54 }
 0x19c   :  { %322 = vrot.lane.b32.xlu0 %v2402_v55, %s2288_s15  ;;  %179 = vrot.lane.b32.xlu2 %v2402_v55, %s2289_s16 }
 0x19d   :  { %v171_v56 = vpop.f32.mrf.mxu0 }
 0x19e   :  { %v175_v57 = vpack.c.bf16 %v171_v56, %v171_v56 }
 0x1a0   :  { %v202_v58 = vunpack.c.l.b16 %v175_v57 }
 0x1a2   :  { %v2408_v59 = vpack.c.b16 %v202_v58, %v202_v58 }
 0x1a4   :  { %485 = vrot.lane.b32.xlu0 %v2408_v59, %s2290_s17  ;;  %345 = vrot.lane.b32.xlu1 %v2408_v59, %s2288_s15 }
 0x1a5   :  { %204 = vrot.lane.b32.xlu2 %v2408_v59, %s2289_s16 }
 0x1ac   :  { %602 = vrot.lane.b32.xlu0 %v2402_v55, %s2291_s18  ;;  %483 = vrot.lane.b32.xlu1 %v2408_v59, %s2292_s19 }
 0x1ad   :  { %320 = vrot.lane.b32.xlu2 %v2402_v55, %s2293_s20 }
 0x1b4   :  { %623 = vrot.lane.b32.xlu0 %v2408_v59, %s2294_s21  ;;  %600 = vrot.lane.b32.xlu1 %v2402_v55, %s2294_s21 }
 0x1b5   :  { %343 = vrot.lane.b32.xlu2 %v2408_v59, %s2293_s20 }
 0x1bd   :  { %462 = vrot.lane.b32.xlu2 %v2402_v55, %s2290_s17 }
 0x1c5   :  { %460 = vrot.lane.b32.xlu2 %v2402_v55, %s2292_s19 }
 0x1cd   :  { %625 = vrot.lane.b32.xlu2 %v2408_v59, %s2291_s18 }
 0x1f6   :  { %v180_v60 = vpop.permute.xlu2 %179 }
 0x1f7   :  { %v186_v61 = vsel %vm181_vm8, %v180_v60, 0 }
 0x1f8   :  { %195 = vmatpush.bf16.xpose.msra.mxu1 %v186_v61 }
 0x1ff   :  { %v205_v62 = vpop.permute.xlu2 %204  ;;  %1959 = vmatmul.msk.bf16.vlgmr.msra.gmra.mxu1 %vm181_vm8, %v174_v53 }
 0x200   :  { %v210_v63 = vsel %vm181_vm8, %v205_v62, 0 }
 0x201   :  { %219 = vmatpush.bf16.xpose.msra.mxu2 %v210_v63 }
 0x207   :  { %v321_v0 = vpop.permute.xlu2 %320 }
 0x208   :  { %1960 = vmatmul.msk.bf16.vlgmr.msra.gmra.mxu2 %vm181_vm8, %v175_v57 }
 0x20e   :  { %v323_v1 = vpop.permute.xlu0 %322 }
 0x20f   :  { %v344_v3 = vpop.permute.xlu2 %343  ;;  %v328_v4 = vsel %vm181_vm8, %v323_v1, 0 }
 0x210   :  { %337 = vmatpush.bf16.xpose.msrb.mxu0 %v328_v4 }
 0x216   :  { %v486_v5 = vpop.permute.xlu0 %485  ;;  %v346_v6 = vpop.permute.xlu1 %345 }
 0x217   :  { %v491_v7 = vsel %vm181_vm8, %v486_v5, 0  ;;  %v463_v8 = vpop.permute.xlu2 %462  ;;  %1963 = vmatmul.msk.bf16.vlgmr.msrb.gmra.mxu0 %vm181_vm8, %v321_v0  ;;  %v351_v9 = vsel %vm181_vm8, %v346_v6, 0 }
 0x218   :  { %v468_v11 = vsel %vm181_vm8, %v463_v8, 0  ;;  %360 = vmatpush.bf16.xpose.msrb.mxu1 %v351_v9 }
 0x219   :  { %477 = vmatpush.bf16.xpose.msra.mxu0 %v468_v11 }
 0x21e   :  { %v603_v12 = vpop.permute.xlu0 %602  ;;  %v484_v17 = vpop.permute.xlu1 %483 }
 0x21f   :  { %v608_v13 = vsel %vm181_vm8, %v603_v12, 0  ;;  %v461_v14 = vpop.permute.xlu2 %460  ;;  %1964 = vmatmul.msk.bf16.vlgmr.msrb.gmra.mxu1 %vm181_vm8, %v344_v3 }
 0x220   :  { %500 = vmatpush.bf16.xpose.msra.mxu1 %v491_v7 }
 0x221   :  { %617 = vmatpush.bf16.xpose.msrb.mxu0 %v608_v13 }
 0x226   :  { %v601_v18 = vpop.permute.xlu1 %600  ;;  %v624_v19 = vpop.permute.xlu0 %623 }
 0x227   :  { %v626_v15 = vpop.permute.xlu2 %625  ;;  %1967 = vmatmul.msk.bf16.vlgmr.msra.gmra.mxu0 %vm181_vm8, %v461_v14 }
 0x228   :  { %v631_v16 = vsel %vm181_vm8, %v626_v15, 0 }
 0x229   :  { %640 = vmatpush.bf16.xpose.msrb.mxu1 %v631_v16 }
 0x22f   :  { %1968 = vmatmul.msk.bf16.vlgmr.msra.gmra.mxu1 %vm181_vm8, %v484_v17 }
 0x237   :  { %1971 = vmatmul.msk.bf16.vlgmr.msrb.gmra.mxu0 %vm181_vm8, %v601_v18 }
 0x23f   :  { %1972 = vmatmul.msk.bf16.vlgmr.msrb.gmra.mxu1 %vm181_vm8, %v624_v19 }
 0x27c   :  { %v197_v20 = vpop.f32.mrf.mxu1 }
 0x27d   :  { %v225_v21 = vmul.f32 0.35355338, %v197_v20 }
 0x27f   :  { %v227_v22 = vsel %vm181_vm8, %v225_v21, -inf }
 0x280   :  { %228 = vmax.xlane.f32.xlu2 %v227_v22 }
 0x284   :  { %v199_v23 = vpop.f32.mrf.mxu1 }
 0x28b   :  { %v221_v24 = vpop.f32.mrf.mxu2 }
 0x28c   :  { %v226_v25 = vmul.f32 0.35355338, %v221_v24 }
 0x28e   :  { %v230_v26 = vsel %vm181_vm8, %v226_v25, -inf }
 0x28f   :  { %231 = vmax.xlane.f32.xlu1 %v230_v26 }
 0x293   :  { %v223_v27 = vpop.f32.mrf.mxu2 }
 0x294   :  { %v339_v28 = vpop.f32.mrf.mxu0 }
 0x295   :  { %v366_v29 = vmul.f32 0.35355338, %v339_v28 }
 0x297   :  { %v368_v30 = vsel %vm181_vm8, %v366_v29, -inf }
 0x298   :  { %369 = vmax.xlane.f32.xlu0 %v368_v30 }
 0x29c   :  { %v341_v31 = vpop.f32.mrf.mxu0  ;;  %v362_v32 = vpop.f32.mrf.mxu1 }
 0x29d   :  { %v367_v33 = vmul.f32 0.35355338, %v362_v32 }
 0x29f   :  { %v371_v34 = vsel %vm181_vm8, %v367_v33, -inf }
 0x2a0   :  { %372 = vmax.xlane.f32.xlu2 %v371_v34 }
 0x2a4   :  { %v364_v35 = vpop.f32.mrf.mxu1  ;;  %v479_v36 = vpop.f32.mrf.mxu0 }
 0x2a5   :  { %v506_v48 = vmul.f32 0.35355338, %v479_v36 }
 0x2a7   :  { %v508_v49 = vsel %vm181_vm8, %v506_v48, -inf }
 0x2a8   :  { %277 = vrot.lane.b32.xlu1 %v2402_v55, %s2295_s22 }
 0x2ac   :  { %v481_v37 = vpop.f32.mrf.mxu0  ;;  %v502_v38 = vpop.f32.mrf.mxu1 }
 0x2ad   :  { %v2456_v39 = vmul.f32 0.35355338, %v502_v38 }
 0x2af   :  { %v511_v40 = vsel %vm181_vm8, %v2456_v39, -inf }
 0x2b0   :  { %512 = vmax.xlane.f32.xlu0 %v511_v40 }
 0x2b4   :  { %v504_v41 = vpop.f32.mrf.mxu1  ;;  %v619_v42 = vpop.f32.mrf.mxu0 }
 0x2b5   :  { %v646_v50 = vmul.f32 0.35355338, %v619_v42 }
 0x2b7   :  { %v648_v51 = vsel %vm181_vm8, %v646_v50, -inf }
 0x2b8   :  { %439 = vrot.lane.b32.xlu2 %v2408_v59, %s2296_s23 }
 0x2bc   :  { %v621_v43 = vpop.f32.mrf.mxu0  ;;  %v642_v44 = vpop.f32.mrf.mxu1 }
 0x2bd   :  { %v647_v45 = vmul.f32 0.35355338, %v642_v44 }
 0x2bf   :  { %v651_v46 = vsel %vm181_vm8, %v647_v45, -inf }
 0x2c0   :  { %652 = vmax.xlane.f32.xlu0 %v651_v46 }
 0x2c4   :  { %v644_v47 = vpop.f32.mrf.mxu1 }
 0x2d2   :  { %509 = vmax.xlane.f32.xlu1 %v508_v49 }
 0x2d4   :  { %299 = vrot.lane.b32.xlu0 %v2408_v59, %s2295_s22 }
 0x2da   :  { %649 = vmax.xlane.f32.xlu1 %v648_v51 }
 0x2f3   :  { %418 = vrot.lane.b32.xlu1 %v2402_v55, %s2296_s23  ;;  %v229_v52 = vpop.xlane.xlu2 %228 }
 0x2f4   :  { %v233_v53 = vsub.f32 %v225_v21, %v229_v52 }
 0x2f6   :  { %v235_v54 = vmul.f32 1.442695, %v233_v53 }
 0x2f8   :  { %2184 = vpow2.f32 %v235_v54 }
 0x2fe   :  { %v2469_v56 = vpop.eup %2184 }
 0x2ff   :  { %v239_v57 = vsel %vm181_vm8, %v2469_v56, 0.0 }
 0x300   :  { %240 = vadd.xlane.f32.xlu2 %v239_v57 }
 0x302   :  { %v232_v58 = vpop.xlane.xlu1 %231 }
 0x303   :  { %v234_v60 = vsub.f32 %v226_v25, %v232_v58 }
 0x305   :  { %v237_v61 = vmul.f32 1.442695, %v234_v60 }
 0x307   :  { %2186 = vpow2.f32 %v237_v61 }
 0x30b   :  { %v370_v62 = vpop.xlane.xlu0 %369 }
 0x30c   :  { %v374_v63 = vsub.f32 %v366_v29, %v370_v62 }
 0x30d   :  { %v2473_v0 = vpop.eup %2186 }
 0x30e   :  { %v376_v1 = vmul.f32 1.442695, %v374_v63  ;;  %v242_v3 = vsel %vm181_vm8, %v2473_v0, 0.0 }
 0x30f   :  { %243 = vadd.xlane.f32.xlu2 %v242_v3 }
 0x310   :  { %2188 = vpow2.f32 %v376_v1 }
 0x313   :  { %v373_v4 = vpop.xlane.xlu2 %372 }
 0x314   :  { %v375_v5 = vsub.f32 %v367_v33, %v373_v4 }
 0x316   :  { %v2477_v6 = vpop.eup %2188  ;;  %v378_v7 = vmul.f32 1.442695, %v375_v5 }
 0x317   :  { %v380_v8 = vsel %vm181_vm8, %v2477_v6, 0.0 }
 0x318   :  { %2190 = vpow2.f32 %v378_v7  ;;  %381 = vadd.xlane.f32.xlu0 %v380_v8 }
 0x31a   :  { %v278_v9 = vpop.permute.xlu1 %277 }
 0x31b   :  { %v284_v11 = vsel %vm282_vm9, %v278_v9, 0  ;;  %v440_v38 = vpop.permute.xlu2 %439 }
 0x31c   :  { %293 = vmatpush.bf16.msra.mxu3 %v284_v11  ;;  %v445_v53 = vsel %vm282_vm9, %v440_v38, 0 }
 0x31e   :  { %v2482_v12 = vpop.eup %2190 }
 0x31f   :  { %v383_v13 = vsel %vm181_vm8, %v2482_v12, 0.0 }
 0x320   :  { %384 = vadd.xlane.f32.xlu2 %v383_v13 }
 0x323   :  { %v513_v14 = vpop.xlane.xlu0 %512 }
 0x324   :  { %v515_v24 = vsub.f32 %v2456_v39, %v513_v14 }
 0x326   :  { %v518_v26 = vmul.f32 1.442695, %v515_v24 }
 0x333   :  { %v653_v15 = vpop.xlane.xlu0 %652 }
 0x334   :  { %v655_v16 = vsub.f32 %v647_v45, %v653_v15 }
 0x336   :  { %v658_v17 = vmul.f32 1.442695, %v655_v16 }
 0x338   :  { %2192 = vpow2.f32 %v658_v17 }
 0x33e   :  { %v2486_v18 = vpop.eup %2192 }
 0x33f   :  { %v663_v19 = vsel %vm181_vm8, %v2486_v18, 0.0 }
 0x340   :  { %664 = vadd.xlane.f32.xlu1 %v663_v19 }
 0x345   :  { %v510_v20 = vpop.xlane.xlu1 %509 }
 0x346   :  { %v514_v21 = vsub.f32 %v506_v48, %v510_v20  ;;  %v300_v22 = vpop.permute.xlu0 %299 }
 0x347   :  { %v305_v23 = vsel %vm282_vm9, %v300_v22, 0 }
 0x348   :  { %v516_v25 = vmul.f32 1.442695, %v514_v21  ;;  %314 = vmatpush.bf16.msrb.mxu3 %v305_v23 }
 0x34a   :  { %2194 = vpow2.f32 %v516_v25 }
 0x34b   :  { %2196 = vpow2.f32 %v518_v26 }
 0x34d   :  { %v650_v27 = vpop.xlane.xlu1 %649 }
 0x34e   :  { %v654_v28 = vsub.f32 %v646_v50, %v650_v27 }
 0x350   :  { %v2492_v29 = vpop.eup %2194  ;;  %v656_v30 = vmul.f32 1.442695, %v654_v28 }
 0x351   :  { %v520_v31 = vsel %vm181_vm8, %v2492_v29, 0.0  ;;  %v2496_v32 = vpop.eup %2196 }
 0x352   :  { %2198 = vpow2.f32 %v656_v30  ;;  %521 = vadd.xlane.f32.xlu2 %v520_v31  ;;  %v523_v35 = vsel %vm181_vm8, %v2496_v32, 0.0 }
 0x358   :  { %v2498_v33 = vpop.eup %2198 }
 0x359   :  { %v660_v34 = vsel %vm181_vm8, %v2498_v33, 0.0 }
 0x35a   :  { %661 = vadd.xlane.f32.xlu0 %v660_v34  ;;  %524 = vadd.xlane.f32.xlu2 %v523_v35 }
 0x365   :  { %v419_v36 = vpop.permute.xlu1 %418 }
 0x366   :  { %v424_v37 = vsel %vm282_vm9, %v419_v36, 0 }
 0x367   :  { %433 = vmatpush.bf16.msrb.mxu2 %v424_v37 }
 0x36e   :  { %719 = vrot.lane.b32.xlu0 %v2408_v59, %s2297_s24 }
 0x372   :  { %558 = vrot.lane.b32.xlu2 %v2402_v55, %s2936_s25 }
 0x373   :  { %v241_v39 = vpop.xlane.xlu2 %240 }
 0x374   :  { %2200 = vrcp.f32 %v241_v39  ;;  %v256_v44 = vand.u32 2147483648, %v241_v39  ;;  %v254_v45 = vand.u32 2147483647, %v241_v39  ;;  %vm250_vm11 = vweird.f32 %v241_v39 }
 0x376   :  { %v257_v48 = vor.u32 1.1754944e-38, %v256_v44  ;;  %vm255_vm13 = vcmp.eq.f32.partialorder %v254_v45, 8.507059e+37 }
 0x37a   :  { %v2201_v40 = vpop.eup %2200  ;;  %579 = vrot.lane.b32.xlu2 %v2408_v59, %s2936_s25 }
 0x37b   :  { %v246_v41 = vmul.f32 %v2201_v40, %v241_v39  ;;  %vm251_vm10 = vweird.f32 %v2201_v40 }
 0x37c   :  { %vm252_vm12 = vmor %vm250_vm11, %vm251_vm10 }
 0x37d   :  { %v247_v42 = vsub.f32 1.0, %v246_v41 }
 0x37f   :  { %v248_v43 = vmul.f32 %v2201_v40, %v247_v42 }
 0x381   :  { %v249_v46 = vadd.f32 %v2201_v40, %v248_v43 }
 0x382   :  { %698 = vrot.lane.b32.xlu2 %v2402_v55, %s2297_s24  ;;  %v244_v47 = vpop.xlane.xlu2 %243 }
 0x383   :  { %2202 = vrcp.f32 %v244_v47  ;;  %v253_v49 = vsel %vm252_vm12, %v2201_v40, %v249_v46  ;;  %v271_v55 = vand.u32 2147483648, %v244_v47  ;;  %v269_v61 = vand.u32 2147483647, %v244_v47 }
 0x384   :  { %v258_v50 = vsel %vm255_vm13, %v257_v48, %v253_v49  ;;  %vm265_vm15 = vweird.f32 %v244_v47 }
 0x385   :  { %v259_v59 = vmul.f32 %v2469_v56, %v258_v50  ;;  %v272_v63 = vor.u32 1.1754944e-38, %v271_v55  ;;  %vm270_vm2 = vcmp.eq.f32.partialorder %v269_v61, 8.507059e+37 }
 0x387   :  { %v275_v51 = vpack.c.bf16 %v259_v59, %v259_v59 }
 0x389   :  { %v2203_v52 = vpop.eup %2202  ;;  %1961 = vmatmul.msk.bf16.vlgmr.msra.gmra.mxu3 %vm181_vm8, %v275_v51 }
 0x38a   :  { %v261_v54 = vmul.f32 %v2203_v52, %v244_v47  ;;  %454 = vmatpush.bf16.msra.mxu3 %v445_v53  ;;  %vm266_vm14 = vweird.f32 %v2203_v52 }
 0x38b   :  { %v382_v57 = vpop.xlane.xlu0 %381  ;;  %vm267_vm1 = vmor %vm265_vm15, %vm266_vm14 }
 0x38c   :  { %v262_v58 = vsub.f32 1.0, %v261_v54  ;;  %2204 = vrcp.f32 %v382_v57  ;;  %v397_v9 = vand.u32 2147483648, %v382_v57  ;;  %v395_v13 = vand.u32 2147483647, %v382_v57 }
 0x38d   :  { %vm391_vm4 = vweird.f32 %v382_v57 }
 0x38e   :  { %v263_v60 = vmul.f32 %v2203_v52, %v262_v58  ;;  %v398_v17 = vor.u32 1.1754944e-38, %v397_v9  ;;  %vm396_vm6 = vcmp.eq.f32.partialorder %v395_v13, 8.507059e+37 }
 0x390   :  { %v264_v62 = vadd.f32 %v2203_v52, %v263_v60 }
 0x392   :  { %v2205_v56 = vpop.eup %2204  ;;  %v268_v1 = vsel %vm267_vm1, %v2203_v52, %v264_v62 }
 0x393   :  { %v387_v3 = vmul.f32 %v2205_v56, %v382_v57  ;;  %v385_v4 = vpop.xlane.xlu2 %384  ;;  %v273_v5 = vsel %vm270_vm2, %v272_v63, %v268_v1  ;;  %vm392_vm3 = vweird.f32 %v2205_v56 }
 0x394   :  { %2206 = vrcp.f32 %v385_v4  ;;  %v274_v8 = vmul.f32 %v2473_v0, %v273_v5  ;;  %vm393_vm5 = vmor %vm391_vm4, %vm392_vm3  ;;  %v412_v0 = vand.u32 2147483648, %v385_v4  ;;  %v410_v25 = vand.u32 2147483647, %v385_v4 }
 0x395   :  { %v388_v7 = vsub.f32 1.0, %v387_v3  ;;  %vm406_vm10 = vweird.f32 %v385_v4 }
 0x396   :  { %v276_v14 = vpack.c.bf16 %v274_v8, %v274_v8  ;;  %v413_v28 = vor.u32 1.1754944e-38, %v412_v0  ;;  %vm411_vm12 = vcmp.eq.f32.partialorder %v410_v25, 8.507059e+37 }
 0x397   :  { %v389_v11 = vmul.f32 %v2205_v56, %v388_v7 }
 0x399   :  { %v390_v15 = vadd.f32 %v2205_v56, %v389_v11  ;;  %1962 = vmatmul.msk.bf16.vlgmr.msrb.gmra.mxu3 %vm181_vm8, %v276_v14 }
 0x39a   :  { %v2207_v16 = vpop.eup %2206 }
 0x39b   :  { %v402_v19 = vmul.f32 %v2207_v16, %v385_v4  ;;  %v394_v20 = vsel %vm393_vm5, %v2205_v56, %v390_v15  ;;  %vm407_vm7 = vweird.f32 %v2207_v16 }
 0x39c   :  { %v399_v21 = vsel %vm396_vm6, %v398_v17, %v394_v20  ;;  %vm408_vm11 = vmor %vm406_vm10, %vm407_vm7 }
 0x39d   :  { %v403_v22 = vsub.f32 1.0, %v402_v19  ;;  %v400_v23 = vmul.f32 %v2477_v6, %v399_v21 }
 0x39f   :  { %v404_v24 = vmul.f32 %v2207_v16, %v403_v22  ;;  %v416_v26 = vpack.c.bf16 %v400_v23, %v400_v23 }
 0x3a1   :  { %v405_v27 = vadd.f32 %v2207_v16, %v404_v24  ;;  %1965 = vmatmul.msk.bf16.vlgmr.msrb.gmra.mxu2 %vm181_vm8, %v416_v26 }
 0x3a3   :  { %v409_v30 = vsel %vm408_vm11, %v2207_v16, %v405_v27 }
 0x3a4   :  { %v414_v31 = vsel %vm411_vm12, %v413_v28, %v409_v30 }
 0x3a5   :  { %v415_v34 = vmul.f32 %v2482_v12, %v414_v31 }
 0x3a7   :  { %v417_v35 = vpack.c.bf16 %v415_v34, %v415_v34 }
 0x3a9   :  { %1966 = vmatmul.msk.bf16.vlgmr.msra.gmra.mxu3 %vm181_vm8, %v417_v35 }
 0x3b3   :  { %v2522_v36 = vpop.xlane.xlu1 %664 }
 0x3b4   :  { %v692_v0 = vand.u32 2147483648, %v2522_v36 }
 0x3b6   :  { %v693_v28 = vor.u32 1.1754944e-38, %v692_v0 }
 0x3c5   :  { %v522_v6 = vpop.xlane.xlu2 %521 }
 0x3c6   :  { %2208 = vrcp.f32 %v522_v6  ;;  %v537_v42 = vand.u32 2147483648, %v522_v6  ;;  %v535_v12 = vand.u32 2147483647, %v522_v6  ;;  %vm531_vm14 = vweird.f32 %v522_v6 }
 0x3c7   :  { %2210 = vrcp.f32 %v2522_v36 }
 0x3c8   :  { %v538_v47 = vor.u32 1.1754944e-38, %v537_v42  ;;  %vm536_vm1 = vcmp.eq.f32.partialorder %v535_v12, 8.507059e+37 }
 0x3cc   :  { %v2209_v37 = vpop.eup %2208 }
 0x3cd   :  { %v527_v38 = vmul.f32 %v2209_v37, %v522_v6  ;;  %v662_v39 = vpop.xlane.xlu0 %661  ;;  %v525_v40 = vpop.xlane.xlu2 %524  ;;  %vm532_vm13 = vweird.f32 %v2209_v37 }
 0x3ce   :  { %2212 = vrcp.f32 %v662_v39  ;;  %v2525_v44 = vpop.eup %2210  ;;  %vm533_vm15 = vmor %vm531_vm14, %vm532_vm13  ;;  %v552_v61 = vand.u32 2147483648, %v525_v40  ;;  %v550_v56 = vand.u32 2147483647, %v525_v40  ;;  %v677_v4 = vand.u32 2147483648, %v662_v39 }
 0x3cf   :  { %v528_v41 = vsub.f32 1.0, %v527_v38  ;;  %2214 = vrcp.f32 %v525_v40  ;;  %v682_v58 = vmul.f32 %v2525_v44, %v2522_v36  ;;  %vm546_vm4 = vweird.f32 %v525_v40 }
 0x3d0   :  { %vm671_vm5 = vweird.f32 %v662_v39  ;;  %v553_v7 = vor.u32 1.1754944e-38, %v552_v61  ;;  %vm551_vm10 = vcmp.eq.f32.partialorder %v550_v56, 8.507059e+37  ;;  %v678_v16 = vor.u32 1.1754944e-38, %v677_v4 }
 0x3d1   :  { %v529_v43 = vmul.f32 %v2209_v37, %v528_v41  ;;  %v683_v3 = vsub.f32 1.0, %v682_v58  ;;  %vm687_vm12 = vweird.f32 %v2525_v44  ;;  %vm686_vm13 = vweird.f32 %v2522_v36 }
 0x3d2   :  { %vm688_vm14 = vmor %vm686_vm13, %vm687_vm12 }
 0x3d3   :  { %v530_v45 = vadd.f32 %v2209_v37, %v529_v43  ;;  %v684_v15 = vmul.f32 %v2525_v44, %v683_v3 }
 0x3d4   :  { %v2213_v46 = vpop.eup %2212 }
 0x3d5   :  { %v2215_v48 = vpop.eup %2214  ;;  %v534_v49 = vsel %vm533_vm15, %v2209_v37, %v530_v45  ;;  %v667_v50 = vmul.f32 %v2213_v46, %v662_v39  ;;  %v559_v59 = vpop.permute.xlu2 %558  ;;  %vm672_vm3 = vweird.f32 %v2213_v46  ;;  %v685_v23 = vadd.f32 %v2525_v44, %v684_v15 }
 0x3d6   :  { %v539_v51 = vsel %vm536_vm1, %v538_v47, %v534_v49  ;;  %v542_v52 = vmul.f32 %v2215_v48, %v525_v40  ;;  %v564_v53 = vsel %vm282_vm9, %v559_v59, 0  ;;  %vm547_vm2 = vweird.f32 %v2215_v48  ;;  %vm673_vm7 = vmor %vm671_vm5, %vm672_vm3  ;;  %v2100_v59 = vld [vmem:[%s2922_s4 + $0x8] sm:$0xff] }
 0x3d7   :  { %v540_v54 = vmul.f32 %v2492_v29, %v539_v51  ;;  %v668_v57 = vsub.f32 1.0, %v667_v50  ;;  %573 = vmatpush.bf16.msra.mxu2 %v564_v53  ;;  %v675_v29 = vand.u32 2147483647, %v662_v39  ;;  %vm548_vm6 = vmor %vm546_vm4, %vm547_vm2  ;;  %v689_v27 = vsel %vm688_vm14, %v2525_v44, %v685_v23  ;;  %798 = vmatpush.bf16.msra.mxu0 %v2100_v59  ;;  %v2099_v51 = vld [vmem:[%s2922_s4] sm:$0xff] }
 0x3d8   :  { %v543_v55 = vsub.f32 1.0, %v542_v52  ;;  %vm766_vm1 = vcmask 130048   ;;  %vm769_vm2 = vcmask 195584   ;;  %vm2939_vm3 = vcmask 1046528  }
 0x3d9   :  { %v669_v60 = vmul.f32 %v2213_v46, %v668_v57  ;;  %v556_v62 = vpack.c.bf16 %v540_v54, %v540_v54  ;;  %vm676_vm11 = vcmp.eq.f32.partialorder %v675_v29, 8.507059e+37 }
 0x3da   :  { %v544_v63 = vmul.f32 %v2215_v48, %v543_v55 }
 0x3db   :  { %v670_v1 = vadd.f32 %v2213_v46, %v669_v60  ;;  %1969 = vmatmul.msk.bf16.vlgmr.msra.gmra.mxu2 %vm181_vm8, %v556_v62  ;;  %799 = vmatpush.bf16.msra.mxu0 %v2099_v51 }
 0x3dc   :  { %v545_v5 = vadd.f32 %v2215_v48, %v544_v63 }
 0x3dd   :  { %v580_v8 = vpop.permute.xlu2 %579  ;;  %v674_v13 = vsel %vm673_vm7, %v2213_v46, %v670_v1 }
 0x3de   :  { %v549_v9 = vsel %vm548_vm6, %v2215_v48, %v545_v5  ;;  %v585_v11 = vsel %vm282_vm9, %v580_v8, 0  ;;  %v679_v21 = vsel %vm676_vm11, %v678_v16, %v674_v13  ;;  %vm2931_vm6 = vcmask 1040384  }
 0x3df   :  { %v554_v14 = vsel %vm551_vm10, %v553_v7, %v549_v9  ;;  %594 = vmatpush.bf16.msrb.mxu3 %v585_v11  ;;  %v680_v24 = vmul.f32 %v2498_v33, %v679_v21  ;;  %v43_v7 = vlaneseq }
 0x3e0   :  { %v555_v17 = vmul.f32 %v2496_v32, %v554_v14  ;;  %v720_v19 = vpop.permute.xlu0 %719  ;;  %v690_v32 = vand.u32 2147483647, %v2522_v36 }
 0x3e1   :  { %v725_v20 = vsel %vm282_vm9, %v720_v19, 0  ;;  %v696_v30 = vpack.c.bf16 %v680_v24, %v680_v24  ;;  %v44_v8 = vshrl.u32 %v43_v7, 7 }
 0x3e2   :  { %v557_v22 = vpack.c.bf16 %v555_v17, %v555_v17  ;;  %vm691_vm15 = vcmp.eq.f32.partialorder %v690_v32, 8.507059e+37  ;;  %v2164_v32 = vld [vmem:[%s2923_s5] ss:$0 sm:$0xff] }
 0x3e3   :  { %734 = vmatpush.bf16.msra.mxu3 %v725_v20  ;;  %v694_v31 = vsel %vm691_vm15, %v693_v28, %v689_v27  ;;  %v45_v11 = vadd.s32 8, %v44_v8  ;;  %v50_v14 = vand.u32 7, %v44_v8 }
 0x3e4   :  { %1970 = vmatmul.msk.bf16.vlgmr.msrb.gmra.mxu3 %vm181_vm8, %v557_v22  ;;  %v695_v34 = vmul.f32 %v2486_v18, %v694_v31 }
 0x3e5   :  { %v699_v25 = vpop.permute.xlu2 %698  ;;  %v57_v13 = vand.u32 7, %v45_v11  ;;  %vm2566_vm4 = vcmp.eq.s32.totalorder %v50_v14, 7  ;;  %vm2590_vm10 = vcmp.eq.s32.totalorder %v50_v14, 0  ;;  %v2167_v14 = vld [vmem:[%s2924_s6] ss:$0 sm:$0xff] }
 0x3e6   :  { %v704_v26 = vsel %vm282_vm9, %v699_v25, 0  ;;  %v697_v33 = vpack.c.bf16 %v695_v34, %v695_v34  ;;  %v2260_v34 = vld [vmem:[%s2918_s0] sm:$0xff] }
 0x3e7   :  { %713 = vmatpush.bf16.msrb.mxu2 %v704_v26  ;;  %vm2570_vm5 = vcmp.eq.s32.totalorder %v57_v13, 7  ;;  %vm2585_vm7 = vcmp.eq.s32.totalorder %v57_v13, 0 }
 0x3eb   :  { %1973 = vmatmul.msk.bf16.vlgmr.msrb.gmra.mxu2 %vm181_vm8, %v696_v30 }
 0x3f4   :  { %1974 = vmatmul.msk.bf16.vlgmr.msra.gmra.mxu3 %vm181_vm8, %v697_v33  ;;  %v830_v33 = vadd.f32 %v2260_v34, %v2164_v32  ;;  %v2104_v34 = vld [vmem:[%s2928_s10 + $0x8] sm:$0xff] }
 0x40c   :  { %v295_v35 = vpop.f32.mrf.mxu3 }
 0x414   :  { %v297_v6 = vpop.f32.mrf.mxu3 }
 0x41c   :  { %v316_v36 = vpop.f32.mrf.mxu3 }
 0x424   :  { %v435_v37 = vpop.f32.mrf.mxu2  ;;  %v318_v38 = vpop.f32.mrf.mxu3 }
 0x42c   :  { %v437_v39 = vpop.f32.mrf.mxu2  ;;  %v456_v40 = vpop.f32.mrf.mxu3 }
 0x42d   :  { %v2134_v41 = vpack.i.bf16 %v456_v40, %v435_v37 }
 0x42f   :  { %2135 = vrot.lane.b32.xlu1 %v2134_v41, %s2934_s26 }
 0x434   :  { %v458_v42 = vpop.f32.mrf.mxu3 }
 0x45e   :  { %v575_v43 = vpop.f32.mrf.mxu2 }
 0x466   :  { %v577_v12 = vpop.f32.mrf.mxu2 }
 0x467   :  { %v596_v44 = vpop.f32.mrf.mxu3 }
 0x468   :  { %v2139_v45 = vpack.i.bf16 %v596_v44, %v575_v43 }
 0x46a   :  { %2140 = vrot.lane.b32.xlu2 %v2139_v45, %s2933_s27 }
 0x46e   :  { %v715_v18 = vpop.f32.mrf.mxu2 }
 0x46f   :  { %v598_v46 = vpop.f32.mrf.mxu3 }
 0x476   :  { %v717_v47 = vpop.f32.mrf.mxu2 }
 0x477   :  { %v736_v48 = vpop.f32.mrf.mxu3 }
 0x478   :  { %v2144_v49 = vpack.i.bf16 %v736_v48, %v715_v18 }
 0x47a   :  { %2145 = vrot.lane.b32.xlu2 %v2144_v49, %s2932_s28 }
 0x47f   :  { %v738_v50 = vpop.f32.mrf.mxu3 }
 0x4a1   :  { %v2136_v53 = vpop.permute.xlu1 %2135 }
 0x4a2   :  { %v2138_v54 = vunpack.i.h.bf16 %v2136_v53  ;;  %v2137_v57 = vunpack.i.l.bf16 %v2136_v53 }
 0x4a4   :  { %v765_v61 = vsel %vm181_vm8, %v316_v36, %v2138_v54  ;;  %v764_v62 = vsel %vm181_vm8, %v295_v35, %v2137_v57  ;;  %v831_v35 = vadd.f32 %v2164_v32, %v2376_v2  ;;  %v2102_v54 = vld [vmem:[%s2926_s8 + $0x8] sm:$0xff]  ;;  %v2101_v57 = vld [vmem:[%s2926_s8] sm:$0xff] }
 0x4a5   :  { %938 = vmatpush.bf16.msra.mxu1 %v2102_v54 }
 0x4a9   :  { %939 = vmatpush.bf16.msra.mxu1 %v2101_v57 }
 0x4c4   :  { %v2141_v52 = vpop.permute.xlu2 %2140 }
 0x4c5   :  { %v2143_v58 = vunpack.i.h.bf16 %v2141_v52  ;;  %v2142_v55 = vunpack.i.l.bf16 %v2141_v52 }
 0x4c7   :  { %v768_v1 = vsel %vm766_vm1, %v765_v61, %v2143_v58  ;;  %v767_v3 = vsel %vm766_vm1, %v764_v62, %v2142_v55 }
 0x4d4   :  { %v2146_v60 = vpop.permute.xlu2 %2145 }
 0x4d5   :  { %v2148_v63 = vunpack.i.h.bf16 %v2146_v60  ;;  %v2147_v56 = vunpack.i.l.bf16 %v2146_v60 }
 0x4d7   :  { %v770_v4 = vsel %vm769_vm2, %v767_v3, %v2147_v56  ;;  %v771_v5 = vsel %vm769_vm2, %v768_v1, %v2148_v63 }
 0x4d8   :  { %v772_v29 = vpack.c.bf16 %v771_v5, %v770_v4 }
 0x4da   :  { %1983 = vmatmul.msk.bf16.vlgmr.msra.gmra.mxu0 %vm2940_vm0, %v772_v29 }
 0x557   :  { %v801_v9 = vpop.f32.mrf.mxu0 }
 0x558   :  { %834 = vrot.lane.b32.xlu0 %v801_v9, %s2289_s16  ;;  %v818_v16 = vrot.slane %v801_v9, 1  ;;  %v809_v24 = vrot.slane %v801_v9, 7 }
 0x55a   :  { %v814_v30 = vsel %vm2931_vm6, 0.0, %v809_v24 }
 0x55b   :  { %v815_v36 = vsel %vm2590_vm10, 0.0, %v814_v30  ;;  %v2106_v30 = vld [vmem:[%s2928_s10 + $0x18] sm:$0xff] }
 0x55c   :  { %v832_v39 = vadd.f32 %v830_v33, %v815_v36  ;;  %993 = vmatpush.bf16.msra.mxu2 %v2106_v30  ;;  %v2103_v33 = vld [vmem:[%s2928_s10] sm:$0xff] }
 0x55f   :  { %v803_v15 = vpop.f32.mrf.mxu0 }
 0x560   :  { %v819_v17 = vrot.slane %v803_v15, 1  ;;  %836 = vrot.lane.b32.xlu2 %v803_v15, %s2289_s16  ;;  %v810_v25 = vrot.slane %v803_v15, 7 }
 0x562   :  { %v820_v21 = vsel %vm2939_vm3, %v818_v16, %v819_v17  ;;  %v823_v22 = vsel %vm2939_vm3, %v819_v17, 0.0  ;;  %v811_v27 = vsel %vm2931_vm6, %v809_v24, %v810_v25  ;;  %v2168_v17 = vld [vmem:[%s2925_s7] ss:$0 sm:$0xff] }
 0x563   :  { %v824_v23 = vsel %vm2566_vm4, 0.0, %v820_v21  ;;  %v825_v0 = vsel %vm2570_vm5, 0.0, %v823_v22  ;;  %v816_v6 = vsel %vm2585_vm7, 0.0, %v811_v27 }
 0x564   :  { %844 = vrot.lane.b32.xlu1 %v824_v23, %s2295_s22  ;;  %846 = vrot.lane.b32.xlu0 %v825_v0, %s2295_s22  ;;  %v833_v38 = vadd.f32 %v831_v35, %v816_v6  ;;  %v2169_v6 = vld [vmem:[%s2927_s9] ss:$0 sm:$0xff] }
 0x5ba   :  { %v837_v37 = vpop.permute.xlu2 %836 }
 0x5bb   :  { %v841_v40 = vadd.f32 %v837_v37, %v833_v38 }
 0x5ca   :  { %v835_v31 = vpop.permute.xlu0 %834 }
 0x5cb   :  { %v840_v41 = vadd.f32 %v835_v31, %v832_v39  ;;  %v2105_v31 = vld [vmem:[%s2928_s10 + $0x10] sm:$0xff] }
 0x5cc   :  { %994 = vmatpush.bf16.msra.mxu2 %v2105_v31 }
 0x5d0   :  { %995 = vmatpush.bf16.msra.mxu2 %v2104_v34 }
 0x5d4   :  { %996 = vmatpush.bf16.msra.mxu2 %v2103_v33 }
 0x5d6   :  { %v845_v42 = vpop.permute.xlu1 %844  ;;  %v847_v43 = vpop.permute.xlu0 %846 }
 0x5d7   :  { %v2603_v12 = vadd.f32 %v845_v42, %v840_v41  ;;  %v2605_v44 = vadd.f32 %v847_v43, %v841_v40  ;;  %v2170_v42 = vld [vmem:[%s2929_s11] ss:$0 sm:$0xff] }
 0x5d9   :  { %v852_v2 = vsel %vm2940_vm0, %v2603_v12, 0.0  ;;  %v855_v45 = vsel %vm2940_vm0, %v2605_v44, 0.0 }
 0x5da   :  { %853 = vadd.xlane.f32.xlu2 %v852_v2  ;;  %856 = vadd.xlane.f32.xlu1 %v855_v45 }
 0x64d   :  { %v854_v18 = vpop.xlane.xlu2 %853  ;;  %v857_v46 = vpop.xlane.xlu1 %856 }
 0x64e   :  { %v858_v47 = vmul.f32 %v854_v18, %v2380_v10  ;;  %v859_v48 = vmul.f32 %v857_v46, %v2380_v10 }
 0x650   :  { %v860_v49 = vsub.f32 %v2603_v12, %v858_v47  ;;  %v861_v50 = vsub.f32 %v2605_v44, %v859_v48 }
 0x652   :  { %v862_v59 = vmul.f32 %v860_v49, %v860_v49  ;;  %v863_v51 = vmul.f32 %v861_v50, %v861_v50 }
 0x654   :  { %v864_v52 = vsel %vm2940_vm0, %v862_v59, 0.0  ;;  %v867_v53 = vsel %vm2940_vm0, %v863_v51, 0.0 }
 0x655   :  { %865 = vadd.xlane.f32.xlu0 %v864_v52  ;;  %868 = vadd.xlane.f32.xlu2 %v867_v53 }
 0x6c8   :  { %v866_v58 = vpop.xlane.xlu0 %865  ;;  %v869_v55 = vpop.xlane.xlu2 %868 }
 0x6c9   :  { %v870_v60 = vmul.f32 %v866_v58, %v2380_v10  ;;  %v871_v61 = vmul.f32 %v869_v55, %v2380_v10  ;;  %v2108_v55 = vld [vmem:[%s2921_s3 + $0x18] sm:$0xff] }
 0x6ca   :  { %1090 = vmatpush.bf16.msrb.mxu3 %v2108_v55 }
 0x6cb   :  { %v872_v62 = vadd.f32 1e-05, %v870_v60  ;;  %v873_v63 = vadd.f32 1e-05, %v871_v61 }
 0x6cd   :  { %2216 = vrsqrt.f32 %v872_v62  ;;  %vm880_vm13 = vweird.f32 %v872_v62  ;;  %vm890_vm15 = vweird.f32 %v873_v63 }
 0x6ce   :  { %2218 = vrsqrt.f32 %v873_v63 }
 0x6d3   :  { %v2217_v56 = vpop.eup %2216 }
 0x6d4   :  { %v2219_v1 = vpop.eup %2218  ;;  %v875_v3 = vmul.f32 %v2217_v56, %v872_v62  ;;  %vm881_vm11 = vweird.f32 %v2217_v56  ;;  %v2107_v62 = vld [vmem:[%s2921_s3 + $0x10] sm:$0xff] }
 0x6d5   :  { %v885_v4 = vmul.f32 %v2219_v1, %v873_v63  ;;  %vm891_vm12 = vweird.f32 %v2219_v1  ;;  %vm882_vm14 = vmor %vm880_vm13, %vm881_vm11  ;;  %1091 = vmatpush.bf16.msrb.mxu3 %v2107_v62 }
 0x6d6   :  { %v876_v5 = vmul.f32 %v2217_v56, %v875_v3  ;;  %vm892_vm6 = vmor %vm890_vm15, %vm891_vm12 }
 0x6d7   :  { %v886_v29 = vmul.f32 %v2219_v1, %v885_v4 }
 0x6d8   :  { %v877_v7 = vmul.f32 0.5, %v876_v5 }
 0x6d9   :  { %v887_v8 = vmul.f32 0.5, %v886_v29 }
 0x6da   :  { %v878_v9 = vsub.f32 1.5, %v877_v7 }
 0x6db   :  { %v888_v11 = vsub.f32 1.5, %v887_v8 }
 0x6dc   :  { %v879_v13 = vmul.f32 %v2217_v56, %v878_v9 }
 0x6dd   :  { %v889_v15 = vmul.f32 %v2219_v1, %v888_v11 }
 0x6de   :  { %v883_v16 = vsel %vm882_vm14, %v2217_v56, %v879_v13 }
 0x6df   :  { %v894_v21 = vmul.f32 %v883_v16, %v860_v49  ;;  %v893_v22 = vsel %vm892_vm6, %v2219_v1, %v889_v15  ;;  %vm2938_vm6 = vcmask 523264  }
 0x6e0   :  { %v895_v23 = vmul.f32 %v893_v22, %v861_v50 }
 0x6e1   :  { %v900_v0 = vmul.f32 %v2167_v14, %v894_v21  ;;  %v2171_v21 = vld [vmem:[%s2919_s1 + $0x1] ss:$0 sm:$0xff]  ;;  %s2949_s1 = smov 48  }
 0x6e2   :  { %v901_v24 = vmul.f32 %v2167_v14, %v895_v23 }
 0x6e3   :  { %v906_v25 = vadd.f32 %v2168_v17, %v900_v0 }
 0x6e4   :  { %v907_v32 = vadd.f32 %v2168_v17, %v901_v24  ;;  %v2172_v24 = vld [vmem:[%s2920_s2 + $0x1] ss:$0 sm:$0xff]  ;;  %s2950_s2 = smov 8  }
 0x6e6   :  { %v908_v27 = vpack.c.bf16 %v907_v32, %v906_v25 }
 0x6e8   :  { %1992 = vmatmul.msk.bf16.vlgmr.msra.gmra.mxu1 %vm2940_vm0, %v908_v27 }
 0x765   :  { %v941_v35 = vpop.f32.mrf.mxu1 }
 0x766   :  { %v942_v36 = vadd.f32 %v2169_v6, %v941_v35 }
 0x768   :  { %v946_v39 = vmax.f32 %v942_v36, 0.0 }
 0x76d   :  { %v943_v37 = vpop.f32.mrf.mxu1 }
 0x76e   :  { %v944_v38 = vadd.f32 %v2169_v6, %v943_v37 }
 0x770   :  { %v947_v40 = vmax.f32 %v944_v38, 0.0 }
 0x772   :  { %v948_v41 = vpack.c.bf16 %v947_v40, %v946_v39 }
 0x774   :  { %2009 = vmatmul.msk.bf16.vlgmr.msra.gmra.mxu2 %vm2938_vm6, %v948_v41 }
 0x7f7   :  { %v998_v43 = vpop.f32.mrf.mxu2 }
 0x7f8   :  { %v999_v2 = vadd.f32 %v2170_v42, %v998_v43 }
 0x7fa   :  { %v2652_v45 = vadd.f32 %v999_v2, %v2603_v12 }
 0x7fc   :  { %v1005_v18 = vsel %vm2940_vm0, %v2652_v45, 0.0 }
 0x7fd   :  { %1006 = vadd.xlane.f32.xlu1 %v1005_v18 }
 0x7ff   :  { %v1000_v46 = vpop.f32.mrf.mxu2 }
 0x800   :  { %v1001_v47 = vadd.f32 %v2170_v42, %v1000_v46 }
 0x802   :  { %v2657_v48 = vadd.f32 %v1001_v47, %v2605_v44 }
 0x804   :  { %v1008_v49 = vsel %vm2940_vm0, %v2657_v48, 0.0 }
 0x805   :  { %1009 = vadd.xlane.f32.xlu0 %v1008_v49 }
 0x870   :  { %v1007_v50 = vpop.xlane.xlu1 %1006 }
 0x871   :  { %v1011_v59 = vmul.f32 %v1007_v50, %v2380_v10 }
 0x873   :  { %v1013_v51 = vsub.f32 %v2652_v45, %v1011_v59 }
 0x875   :  { %v1015_v12 = vmul.f32 %v1013_v51, %v1013_v51 }
 0x877   :  { %v1017_v52 = vsel %vm2940_vm0, %v1015_v12, 0.0 }
 0x878   :  { %v1010_v53 = vpop.xlane.xlu0 %1009  ;;  %1018 = vadd.xlane.f32.xlu2 %v1017_v52 }
 0x879   :  { %v1012_v54 = vmul.f32 %v1010_v53, %v2380_v10 }
 0x87b   :  { %v1014_v57 = vsub.f32 %v2657_v48, %v1012_v54 }
 0x87d   :  { %v1016_v44 = vmul.f32 %v1014_v57, %v1014_v57 }
 0x87f   :  { %v1020_v58 = vsel %vm2940_vm0, %v1016_v44, 0.0 }
 0x880   :  { %1021 = vadd.xlane.f32.xlu1 %v1020_v58 }
 0x8eb   :  { %v1019_v60 = vpop.xlane.xlu2 %1018 }
 0x8ec   :  { %v1023_v61 = vmul.f32 %v1019_v60, %v2380_v10 }
 0x8ee   :  { %v1025_v63 = vadd.f32 1e-05, %v1023_v61 }
 0x8f0   :  { %2220 = vrsqrt.f32 %v1025_v63  ;;  %vm1033_vm12 = vweird.f32 %v1025_v63 }
 0x8f3   :  { %v1022_v56 = vpop.xlane.xlu1 %1021 }
 0x8f4   :  { %v1024_v1 = vmul.f32 %v1022_v56, %v2380_v10 }
 0x8f6   :  { %v2221_v3 = vpop.eup %2220  ;;  %v1026_v4 = vadd.f32 1e-05, %v1024_v1 }
 0x8f7   :  { %v1028_v5 = vmul.f32 %v2221_v3, %v1025_v63  ;;  %vm1034_vm11 = vweird.f32 %v2221_v3 }
 0x8f8   :  { %2222 = vrsqrt.f32 %v1026_v4  ;;  %vm1035_vm13 = vmor %vm1033_vm12, %vm1034_vm11  ;;  %vm1043_vm15 = vweird.f32 %v1026_v4 }
 0x8f9   :  { %v1029_v29 = vmul.f32 %v2221_v3, %v1028_v5 }
 0x8fb   :  { %v1030_v7 = vmul.f32 0.5, %v1029_v29 }
 0x8fd   :  { %v1031_v8 = vsub.f32 1.5, %v1030_v7 }
 0x8fe   :  { %v2223_v9 = vpop.eup %2222 }
 0x8ff   :  { %v1032_v11 = vmul.f32 %v2221_v3, %v1031_v8  ;;  %v1038_v13 = vmul.f32 %v2223_v9, %v1026_v4  ;;  %vm1044_vm14 = vweird.f32 %v2223_v9 }
 0x900   :  { %vm1045_vm6 = vmor %vm1043_vm15, %vm1044_vm14 }
 0x901   :  { %v1039_v14 = vmul.f32 %v2223_v9, %v1038_v13  ;;  %v1036_v15 = vsel %vm1035_vm13, %v2221_v3, %v1032_v11 }
 0x902   :  { %v1047_v22 = vmul.f32 %v1036_v15, %v1013_v51 }
 0x903   :  { %v1040_v16 = vmul.f32 0.5, %v1039_v14 }
 0x904   :  { %v1054_v25 = vmul.f32 %v2171_v21, %v1047_v22 }
 0x905   :  { %v1041_v17 = vsub.f32 1.5, %v1040_v16 }
 0x906   :  { %v1061_v30 = vadd.f32 %v2172_v24, %v1054_v25 }
 0x907   :  { %v1042_v23 = vmul.f32 %v2223_v9, %v1041_v17 }
 0x909   :  { %v1046_v0 = vsel %vm1045_vm6, %v2223_v9, %v1042_v23 }
 0x90a   :  { %v1048_v32 = vmul.f32 %v1046_v0, %v1014_v57 }
 0x90c   :  { %v1055_v27 = vmul.f32 %v2171_v21, %v1048_v32 }
 0x90e   :  { %v1062_v31 = vadd.f32 %v2172_v24, %v1055_v27 }
 0x910   :  { %v1063_v34 = vpack.c.bf16 %v1062_v31, %v1061_v30 }
 0x912   :  { %2024 = vmatmul.msk.bf16.vlgmr.msrb.gmra.mxu3 %vm2940_vm0, %v1063_v34 }
 0x995   :  { %v1093_v33 = vpop.f32.mrf.mxu3 }
 0x996   :  { %v1098_v35 = vpack.c.bf16 %v1093_v33, %v1093_v33 }
 0x998   :  { %v1101_v6 = vunpack.c.l.b16 %v1098_v35 }
 0x99a   :  { %v2682_v36 = vpack.c.b16 %v1101_v6, %v1101_v6 }
 0x99c   :  { %1244 = vrot.lane.b32.xlu1 %v2682_v36, %s2288_s15  ;;  %1103 = vrot.lane.b32.xlu0 %v2682_v36, %s2289_s16 }
 0x99d   :  { %v1095_v37 = vpop.f32.mrf.mxu3 }
 0x99e   :  { %v1099_v38 = vpack.c.bf16 %v1095_v37, %v1095_v37 }
 0x9a0   :  { %v1125_v39 = vunpack.c.l.b16 %v1099_v38 }
 0x9a2   :  { %v2688_v40 = vpack.c.b16 %v1125_v39, %v1125_v39 }
 0x9a4   :  { %1384 = vrot.lane.b32.xlu1 %v2682_v36, %s2290_s17  ;;  %1267 = vrot.lane.b32.xlu0 %v2688_v40, %s2288_s15  ;;  %s2951_s15 = smov 16  }
 0x9a5   :  { %1127 = vrot.lane.b32.xlu2 %v2688_v40, %s2289_s16 }
 0x9ac   :  { %1405 = vrot.lane.b32.xlu1 %v2688_v40, %s2292_s19  ;;  %1265 = vrot.lane.b32.xlu0 %v2688_v40, %s2293_s20 }
 0x9ad   :  { %1242 = vrot.lane.b32.xlu2 %v2682_v36, %s2293_s20 }
 0x9b4   :  { %1522 = vrot.lane.b32.xlu1 %v2682_v36, %s2294_s21  ;;  %1382 = vrot.lane.b32.xlu0 %v2682_v36, %s2292_s19  ;;  %s2302_s19 = smov [#allocation2]  }
 0x9b5   :  { %1407 = vrot.lane.b32.xlu2 %v2688_v40, %s2290_s17  ;;  %s2952_s17 = smov 24   ;;  %s1936_s20 = sshll.u32 %s2302_s19, 4  ;;  %s1937_s20 = int_to_ptr.vmem [resolvable:$true] %s1936_s20 }
 0x9bc   :  { %1547 = vrot.lane.b32.xlu0 %v2688_v40, %s2291_s18 }
 0x9bd   :  { %1524 = vrot.lane.b32.xlu2 %v2682_v36, %s2291_s18  ;;  %s1938_s18 = sshll.u32 %s2930_s12, 4  ;;  %s1939_s18 = int_to_ptr.hbm [resolvable:$true] %s1938_s18 }
 0x9c5   :  { %1545 = vrot.lane.b32.xlu2 %v2688_v40, %s2294_s21 }
 0x9ff   :  { %v1128_v41 = vpop.permute.xlu2 %1127 }
 0xa00   :  { %v1133_v42 = vsel %vm181_vm8, %v1128_v41, 0 }
 0xa01   :  { %1142 = vmatpush.bf16.xpose.msrb.mxu1 %v1133_v42 }
 0xa07   :  { %v1243_v43 = vpop.permute.xlu2 %1242 }
 0xa08   :  { %2026 = vmatmul.msk.bf16.vlgmr.msrb.gmra.mxu1 %vm181_vm8, %v1099_v38 }
 0xa0e   :  { %v1245_v2 = vpop.permute.xlu1 %1244  ;;  %v1104_v18 = vpop.permute.xlu0 %1103 }
 0xa0f   :  { %v1250_v46 = vsel %vm181_vm8, %v1245_v2, 0  ;;  %v1109_v47 = vsel %vm181_vm8, %v1104_v18, 0  ;;  %v1408_v49 = vpop.permute.xlu2 %1407 }
 0xa10   :  { %1118 = vmatpush.bf16.xpose.msrb.mxu0 %v1109_v47  ;;  %v1413_v52 = vsel %vm181_vm8, %v1408_v49, 0 }
 0xa16   :  { %v1385_v50 = vpop.permute.xlu1 %1384  ;;  %v1268_v59 = vpop.permute.xlu0 %1267 }
 0xa17   :  { %v1390_v51 = vsel %vm181_vm8, %v1385_v50, 0  ;;  %v1273_v12 = vsel %vm181_vm8, %v1268_v59, 0  ;;  %2025 = vmatmul.msk.bf16.vlgmr.msrb.gmra.mxu0 %vm181_vm8, %v1098_v35  ;;  %v1525_v54 = vpop.permute.xlu2 %1524 }
 0xa18   :  { %1259 = vmatpush.bf16.xpose.msra.mxu0 %v1250_v46  ;;  %1282 = vmatpush.bf16.xpose.msra.mxu1 %v1273_v12  ;;  %v1530_v44 = vsel %vm181_vm8, %v1525_v54, 0 }
 0xa1e   :  { %v1266_v53 = vpop.permute.xlu0 %1265  ;;  %v1406_v58 = vpop.permute.xlu1 %1405 }
 0xa1f   :  { %2030 = vmatmul.msk.bf16.vlgmr.msra.gmra.mxu1 %vm181_vm8, %v1266_v53  ;;  %v1546_v61 = vpop.permute.xlu2 %1545 }
 0xa20   :  { %1399 = vmatpush.bf16.xpose.msrb.mxu0 %v1390_v51  ;;  %1422 = vmatpush.bf16.xpose.msrb.mxu1 %v1413_v52 }
 0xa26   :  { %v1383_v57 = vpop.permute.xlu0 %1382  ;;  %v1523_v62 = vpop.permute.xlu1 %1522 }
 0xa27   :  { %2029 = vmatmul.msk.bf16.vlgmr.msra.gmra.mxu0 %vm181_vm8, %v1243_v43 }
 0xa28   :  { %1539 = vmatpush.bf16.xpose.msra.mxu0 %v1530_v44 }
 0xa2e   :  { %v1548_v55 = vpop.permute.xlu0 %1547 }
 0xa2f   :  { %v1553_v60 = vsel %vm181_vm8, %v1548_v55, 0  ;;  %2034 = vmatmul.msk.bf16.vlgmr.msrb.gmra.mxu1 %vm181_vm8, %v1406_v58 }
 0xa30   :  { %1562 = vmatpush.bf16.xpose.msra.mxu1 %v1553_v60 }
 0xa37   :  { %2033 = vmatmul.msk.bf16.vlgmr.msrb.gmra.mxu0 %vm181_vm8, %v1383_v57 }
 0xa3f   :  { %2038 = vmatmul.msk.bf16.vlgmr.msra.gmra.mxu1 %vm181_vm8, %v1546_v61 }
 0xa47   :  { %2037 = vmatmul.msk.bf16.vlgmr.msra.gmra.mxu0 %vm181_vm8, %v1523_v62 }
 0xa85   :  { %v1144_v63 = vpop.f32.mrf.mxu1 }
 0xa86   :  { %v1149_v56 = vmul.f32 0.35355338, %v1144_v63 }
 0xa88   :  { %v1153_v1 = vsel %vm181_vm8, %v1149_v56, -inf }
 0xa89   :  { %1154 = vmax.xlane.f32.xlu1 %v1153_v1 }
 0xa8d   :  { %v1146_v3 = vpop.f32.mrf.mxu1 }
 0xa94   :  { %v1120_v4 = vpop.f32.mrf.mxu0 }
 0xa95   :  { %v1148_v5 = vmul.f32 0.35355338, %v1120_v4 }
 0xa97   :  { %v1150_v29 = vsel %vm181_vm8, %v1148_v5, -inf }
 0xa98   :  { %1151 = vmax.xlane.f32.xlu0 %v1150_v29 }
 0xa9c   :  { %v1122_v7 = vpop.f32.mrf.mxu0  ;;  %v1284_v8 = vpop.f32.mrf.mxu1 }
 0xa9d   :  { %v2732_v9 = vmul.f32 0.35355338, %v1284_v8 }
 0xa9f   :  { %v1293_v11 = vsel %vm181_vm8, %v2732_v9, -inf }
 0xaa0   :  { %1294 = vmax.xlane.f32.xlu0 %v1293_v11 }
 0xaa4   :  { %v1261_v13 = vpop.f32.mrf.mxu0  ;;  %v1286_v14 = vpop.f32.mrf.mxu1 }
 0xaa5   :  { %v1288_v15 = vmul.f32 0.35355338, %v1261_v13 }
 0xaa7   :  { %v1290_v16 = vsel %vm181_vm8, %v1288_v15, -inf }
 0xaa8   :  { %1291 = vmax.xlane.f32.xlu2 %v1290_v16 }
 0xaac   :  { %v1263_v17 = vpop.f32.mrf.mxu0  ;;  %v1424_v21 = vpop.f32.mrf.mxu1 }
 0xaad   :  { %v2737_v22 = vmul.f32 0.35355338, %v1424_v21 }
 0xaaf   :  { %v1433_v23 = vsel %vm181_vm8, %v2737_v22, -inf }
 0xab0   :  { %1434 = vmax.xlane.f32.xlu1 %v1433_v23 }
 0xab4   :  { %1200 = vrot.lane.b32.xlu0 %v2682_v36, %s2295_s22  ;;  %v1401_v0 = vpop.f32.mrf.mxu0  ;;  %v1426_v24 = vpop.f32.mrf.mxu1 }
 0xab5   :  { %v1428_v25 = vmul.f32 0.35355338, %v1401_v0 }
 0xab7   :  { %v1430_v32 = vsel %vm181_vm8, %v1428_v25, -inf }
 0xab8   :  { %1431 = vmax.xlane.f32.xlu2 %v1430_v32 }
 0xabc   :  { %v1403_v27 = vpop.f32.mrf.mxu0  ;;  %v1564_v30 = vpop.f32.mrf.mxu1 }
 0xabd   :  { %v1569_v31 = vmul.f32 0.35355338, %v1564_v30 }
 0xabf   :  { %v1573_v34 = vsel %vm181_vm8, %v1569_v31, -inf }
 0xac0   :  { %1574 = vmax.xlane.f32.xlu2 %v1573_v34 }
 0xac4   :  { %v1541_v33 = vpop.f32.mrf.mxu0  ;;  %v1566_v35 = vpop.f32.mrf.mxu1 }
 0xac5   :  { %v1568_v37 = vmul.f32 0.35355338, %v1541_v33 }
 0xac7   :  { %v1570_v38 = vsel %vm181_vm8, %v1568_v37, -inf }
 0xacc   :  { %v1543_v6 = vpop.f32.mrf.mxu0 }
 0xade   :  { %1571 = vmax.xlane.f32.xlu0 %v1570_v38 }
 0xafc   :  { %v1155_v39 = vpop.xlane.xlu1 %1154 }
 0xafd   :  { %v1157_v41 = vsub.f32 %v1149_v56, %v1155_v39 }
 0xaff   :  { %v1160_v42 = vmul.f32 1.442695, %v1157_v41 }
 0xb01   :  { %2224 = vpow2.f32 %v1160_v42 }
 0xb07   :  { %v2746_v43 = vpop.eup %2224 }
 0xb08   :  { %v1165_v2 = vsel %vm181_vm8, %v2746_v43, 0.0 }
 0xb09   :  { %1166 = vadd.xlane.f32.xlu0 %v1165_v2 }
 0xb0b   :  { %v1152_v18 = vpop.xlane.xlu0 %1151 }
 0xb0c   :  { %v1156_v46 = vsub.f32 %v1148_v5, %v1152_v18 }
 0xb0e   :  { %v1158_v47 = vmul.f32 1.442695, %v1156_v46 }
 0xb10   :  { %2226 = vpow2.f32 %v1158_v47 }
 0xb13   :  { %v1295_v12 = vpop.xlane.xlu0 %1294 }
 0xb14   :  { %v1297_v56 = vsub.f32 %v2732_v9, %v1295_v12 }
 0xb16   :  { %v2750_v49 = vpop.eup %2226  ;;  %v1300_v1 = vmul.f32 1.442695, %v1297_v56 }
 0xb17   :  { %v1162_v50 = vsel %vm181_vm8, %v2750_v49, 0.0 }
 0xb18   :  { %1163 = vadd.xlane.f32.xlu1 %v1162_v50 }
 0xb1b   :  { %v1292_v59 = vpop.xlane.xlu2 %1291 }
 0xb1c   :  { %v1296_v51 = vsub.f32 %v1288_v15, %v1292_v59 }
 0xb1d   :  { %1340 = vrot.lane.b32.xlu0 %v2682_v36, %s2296_s23 }
 0xb1e   :  { %v1298_v52 = vmul.f32 1.442695, %v1296_v51 }
 0xb20   :  { %2228 = vpow2.f32 %v1298_v52 }
 0xb23   :  { %v1435_v29 = vpop.xlane.xlu1 %1434 }
 0xb24   :  { %v1437_v11 = vsub.f32 %v2737_v22, %v1435_v29 }
 0xb26   :  { %v2756_v53 = vpop.eup %2228  ;;  %v1201_v54 = vpop.permute.xlu0 %1200  ;;  %v1440_v15 = vmul.f32 1.442695, %v1437_v11 }
 0xb27   :  { %v1206_v57 = vsel %vm282_vm9, %v1201_v54, 0  ;;  %v1302_v44 = vsel %vm181_vm8, %v2756_v53, 0.0 }
 0xb28   :  { %1215 = vmatpush.bf16.msrb.mxu2 %v1206_v57  ;;  %1303 = vadd.xlane.f32.xlu2 %v1302_v44 }
 0xb2b   :  { %v1432_v58 = vpop.xlane.xlu2 %1431 }
 0xb2c   :  { %v1436_v3 = vsub.f32 %v1428_v25, %v1432_v58 }
 0xb2e   :  { %v1438_v5 = vmul.f32 1.442695, %v1436_v3 }
 0xb31   :  { %1361 = vrot.lane.b32.xlu1 %v2688_v40, %s2296_s23 }
 0xb33   :  { %v1575_v55 = vpop.xlane.xlu2 %1574 }
 0xb34   :  { %v1577_v60 = vsub.f32 %v1569_v31, %v1575_v55 }
 0xb36   :  { %v1580_v61 = vmul.f32 1.442695, %v1577_v60 }
 0xb38   :  { %2230 = vpow2.f32 %v1580_v61 }
 0xb39   :  { %2232 = vpow2.f32 %v1300_v1 }
 0xb3a   :  { %2234 = vpow2.f32 %v1438_v5 }
 0xb3e   :  { %v2765_v62 = vpop.eup %2230 }
 0xb3f   :  { %v1585_v63 = vsel %vm181_vm8, %v2765_v62, 0.0  ;;  %v2770_v7 = vpop.eup %2232 }
 0xb40   :  { %1221 = vrot.lane.b32.xlu2 %v2688_v40, %s2295_s22  ;;  %v1305_v13 = vsel %vm181_vm8, %v2770_v7, 0.0  ;;  %v2775_v16 = vpop.eup %2234 }
 0xb41   :  { %v1442_v9 = vsel %vm181_vm8, %v2775_v16, 0.0 }
 0xb47   :  { %1586 = vadd.xlane.f32.xlu0 %v1585_v63 }
 0xb51   :  { %v1572_v4 = vpop.xlane.xlu0 %1571 }
 0xb52   :  { %v1576_v8 = vsub.f32 %v1568_v37, %v1572_v4 }
 0xb54   :  { %v1578_v14 = vmul.f32 1.442695, %v1576_v8 }
 0xb56   :  { %2236 = vpow2.f32 %v1578_v14 }
 0xb57   :  { %2238 = vpow2.f32 %v1440_v15 }
 0xb5b   :  { %1306 = vadd.xlane.f32.xlu1 %v1305_v13 }
 0xb5c   :  { %v2779_v17 = vpop.eup %2236 }
 0xb5d   :  { %v2781_v21 = vpop.eup %2238  ;;  %v1582_v22 = vsel %vm181_vm8, %v2779_v17, 0.0 }
 0xb5e   :  { %v1445_v23 = vsel %vm181_vm8, %v2781_v21, 0.0 }
 0xb63   :  { %1443 = vadd.xlane.f32.xlu1 %v1442_v9 }
 0xb69   :  { %1583 = vadd.xlane.f32.xlu2 %v1582_v22 }
 0xb6b   :  { %1446 = vadd.xlane.f32.xlu1 %v1445_v23 }
 0xb7c   :  { %v1167_v0 = vpop.xlane.xlu0 %1166 }
 0xb7d   :  { %2240 = vrcp.f32 %v1167_v0  ;;  %v1194_v42 = vand.u32 2147483648, %v1167_v0  ;;  %vm1188_vm13 = vweird.f32 %v1167_v0  ;;  %v1192_v2 = vand.u32 2147483647, %v1167_v0 }
 0xb7f   :  { %v1195_v59 = vor.u32 1.1754944e-38, %v1194_v42  ;;  %vm1193_vm0 = vcmp.eq.f32.partialorder %v1192_v2, 8.507059e+37 }
 0xb81   :  { %1641 = vrot.lane.b32.xlu2 %v2688_v40, %s2297_s24 }
 0xb83   :  { %v2241_v24 = vpop.eup %2240 }
 0xb84   :  { %1480 = vrot.lane.b32.xlu1 %v2682_v36, %s2949_s1  ;;  %v1184_v32 = vmul.f32 %v2241_v24, %v1167_v0  ;;  %vm1189_vm11 = vweird.f32 %v2241_v24 }
 0xb85   :  { %vm1190_vm15 = vmor %vm1188_vm13, %vm1189_vm11 }
 0xb86   :  { %v1185_v30 = vsub.f32 1.0, %v1184_v32 }
 0xb88   :  { %v1186_v35 = vmul.f32 %v2241_v24, %v1185_v30 }
 0xb8a   :  { %v1187_v41 = vadd.f32 %v2241_v24, %v1186_v35 }
 0xb8b   :  { %v1164_v25 = vpop.xlane.xlu1 %1163 }
 0xb8c   :  { %2242 = vrcp.f32 %v1164_v25  ;;  %1501 = vrot.lane.b32.xlu1 %v2688_v40, %s2949_s1  ;;  %v1179_v37 = vand.u32 2147483648, %v1164_v25  ;;  %v1177_v39 = vand.u32 2147483647, %v1164_v25  ;;  %vm1173_vm12 = vweird.f32 %v1164_v25 }
 0xb8d   :  { %v1191_v50 = vsel %vm1190_vm15, %v2241_v24, %v1187_v41 }
 0xb8e   :  { %v1180_v18 = vor.u32 1.1754944e-38, %v1179_v37  ;;  %vm1178_vm3 = vcmp.eq.f32.partialorder %v1177_v39, 8.507059e+37  ;;  %v1196_v12 = vsel %vm1193_vm0, %v1195_v59, %v1191_v50 }
 0xb8f   :  { %v1341_v27 = vpop.permute.xlu0 %1340  ;;  %v1197_v57 = vmul.f32 %v2746_v43, %v1196_v12 }
 0xb90   :  { %v1346_v31 = vsel %vm282_vm9, %v1341_v27, 0 }
 0xb91   :  { %1355 = vmatpush.bf16.msra.mxu2 %v1346_v31 }
 0xb92   :  { %v2243_v34 = vpop.eup %2242 }
 0xb93   :  { %v1169_v33 = vmul.f32 %v2243_v34, %v1164_v25  ;;  %vm1174_vm6 = vweird.f32 %v2243_v34 }
 0xb94   :  { %1620 = vrot.lane.b32.xlu1 %v2682_v36, %s2297_s24  ;;  %vm1175_vm14 = vmor %vm1173_vm12, %vm1174_vm6 }
 0xb95   :  { %v1170_v6 = vsub.f32 1.0, %v1169_v33 }
 0xb97   :  { %v1171_v38 = vmul.f32 %v2243_v34, %v1170_v6 }
 0xb99   :  { %v1172_v40 = vadd.f32 %v2243_v34, %v1171_v38 }
 0xb9b   :  { %v1176_v46 = vsel %vm1175_vm14, %v2243_v34, %v1172_v40  ;;  %v1304_v47 = vpop.xlane.xlu2 %1303 }
 0xb9c   :  { %v1181_v36 = vsel %vm1178_vm3, %v1180_v18, %v1176_v46  ;;  %2244 = vrcp.f32 %v1304_v47  ;;  %v1319_v56 = vand.u32 2147483648, %v1304_v47  ;;  %v1317_v3 = vand.u32 2147483647, %v1304_v47 }
 0xb9d   :  { %v1182_v51 = vmul.f32 %v2750_v49, %v1181_v36  ;;  %v1199_v49 = vpack.c.bf16 %v1197_v57, %v1197_v57  ;;  %vm1313_vm3 = vweird.f32 %v1304_v47 }
 0xb9e   :  { %v1320_v43 = vor.u32 1.1754944e-38, %v1319_v56  ;;  %vm1318_vm11 = vcmp.eq.f32.partialorder %v1317_v3, 8.507059e+37 }
 0xb9f   :  { %v1198_v52 = vpack.c.bf16 %v1182_v51, %v1182_v51 }
 0xba1   :  { %2027 = vmatmul.msk.bf16.vlgmr.msrb.gmra.mxu2 %vm181_vm8, %v1198_v52 }
 0xba2   :  { %v2245_v54 = vpop.eup %2244 }
 0xba3   :  { %v1309_v44 = vmul.f32 %v2245_v54, %v1304_v47  ;;  %v1362_v58 = vpop.permute.xlu1 %1361  ;;  %v1222_v55 = vpop.permute.xlu2 %1221  ;;  %vm1314_vm0 = vweird.f32 %v2245_v54 }
 0xba4   :  { %v1367_v60 = vsel %vm282_vm9, %v1362_v58, 0  ;;  %v1227_v61 = vsel %vm282_vm9, %v1222_v55, 0  ;;  %vm1315_vm6 = vmor %vm1313_vm3, %vm1314_vm0 }
 0xba5   :  { %v1310_v63 = vsub.f32 1.0, %v1309_v44  ;;  %1236 = vmatpush.bf16.msra.mxu3 %v1227_v61 }
 0xba7   :  { %v1311_v1 = vmul.f32 %v2245_v54, %v1310_v63 }
 0xba8   :  { %2028 = vmatmul.msk.bf16.vlgmr.msra.gmra.mxu3 %vm181_vm8, %v1199_v49 }
 0xba9   :  { %1376 = vmatpush.bf16.msrb.mxu3 %v1367_v60  ;;  %v1312_v4 = vadd.f32 %v2245_v54, %v1311_v1 }
 0xbab   :  { %v1316_v5 = vsel %vm1315_vm6, %v2245_v54, %v1312_v4 }
 0xbac   :  { %v1321_v29 = vsel %vm1318_vm11, %v1320_v43, %v1316_v5 }
 0xbad   :  { %v1322_v8 = vmul.f32 %v2756_v53, %v1321_v29 }
 0xbaf   :  { %v1338_v11 = vpack.c.bf16 %v1322_v8, %v1322_v8 }
 0xbb1   :  { %2031 = vmatmul.msk.bf16.vlgmr.msra.gmra.mxu2 %vm181_vm8, %v1338_v11 }
 0xbba   :  { %v2806_v42 = vpop.xlane.xlu0 %1586 }
 0xbce   :  { %v1307_v13 = vpop.xlane.xlu1 %1306 }
 0xbcf   :  { %2246 = vrcp.f32 %v1307_v13  ;;  %v1334_v23 = vand.u32 2147483648, %v1307_v13  ;;  %v1332_v24 = vand.u32 2147483647, %v1307_v13  ;;  %vm1328_vm13 = vweird.f32 %v1307_v13 }
 0xbd1   :  { %v1335_v27 = vor.u32 1.1754944e-38, %v1334_v23  ;;  %vm1333_vm15 = vcmp.eq.f32.partialorder %v1332_v24, 8.507059e+37 }
 0xbd5   :  { %v2247_v14 = vpop.eup %2246 }
 0xbd6   :  { %v1324_v15 = vmul.f32 %v2247_v14, %v1307_v13  ;;  %v1444_v9 = vpop.xlane.xlu1 %1443  ;;  %vm1329_vm12 = vweird.f32 %v2247_v14 }
 0xbd7   :  { %2248 = vrcp.f32 %v1444_v9  ;;  %vm1330_vm14 = vmor %vm1328_vm13, %vm1329_vm12  ;;  %v1459_v46 = vand.u32 2147483648, %v1444_v9  ;;  %vm1453_vm3 = vweird.f32 %v1444_v9  ;;  %v1457_v47 = vand.u32 2147483647, %v1444_v9 }
 0xbd8   :  { %v1325_v22 = vsub.f32 1.0, %v1324_v15 }
 0xbd9   :  { %v1460_v59 = vor.u32 1.1754944e-38, %v1459_v46  ;;  %vm1458_vm11 = vcmp.eq.f32.partialorder %v1457_v47, 8.507059e+37 }
 0xbda   :  { %v1326_v0 = vmul.f32 %v2247_v14, %v1325_v22 }
 0xbdc   :  { %v1327_v25 = vadd.f32 %v2247_v14, %v1326_v0  ;;  %v1584_v37 = vpop.xlane.xlu2 %1583 }
 0xbdd   :  { %v2249_v32 = vpop.eup %2248  ;;  %v1597_v5 = vand.u32 2147483647, %v1584_v37 }
 0xbde   :  { %v1331_v53 = vsel %vm1330_vm14, %v2247_v14, %v1327_v25  ;;  %v1447_v30 = vpop.xlane.xlu1 %1446  ;;  %v1449_v34 = vmul.f32 %v2249_v32, %v1444_v9  ;;  %vm1454_vm0 = vweird.f32 %v2249_v32  ;;  %v1612_v25 = vand.u32 2147483647, %v2806_v42 }
 0xbdf   :  { %v1336_v31 = vsel %vm1333_vm15, %v1335_v27, %v1331_v53  ;;  %2250 = vrcp.f32 %v1447_v30  ;;  %vm1455_vm6 = vmor %vm1453_vm3, %vm1454_vm0  ;;  %v1474_v57 = vand.u32 2147483648, %v1447_v30  ;;  %vm1468_vm13 = vweird.f32 %v1447_v30 }
 0xbe0   :  { %v1337_v33 = vmul.f32 %v2770_v7, %v1336_v31  ;;  %v1450_v6 = vsub.f32 1.0, %v1449_v34  ;;  %2252 = vrcp.f32 %v1584_v37  ;;  %v1472_v58 = vand.u32 2147483647, %v1447_v30 }
 0xbe1   :  { %2254 = vrcp.f32 %v2806_v42  ;;  %v1475_v49 = vor.u32 1.1754944e-38, %v1474_v57  ;;  %vm1593_vm3 = vweird.f32 %v1584_v37  ;;  %v2109_v57 = vld [vmem:[%s2922_s4 + $0x10] sm:$0xff] }
 0xbe2   :  { %v1339_v35 = vpack.c.bf16 %v1337_v33, %v1337_v33  ;;  %v1451_v39 = vmul.f32 %v2249_v32, %v1450_v6  ;;  %vm1473_vm15 = vcmp.eq.f32.partialorder %v1472_v58, 8.507059e+37 }
 0xbe4   :  { %2032 = vmatmul.msk.bf16.vlgmr.msrb.gmra.mxu3 %vm181_vm8, %v1339_v35  ;;  %v1452_v40 = vadd.f32 %v2249_v32, %v1451_v39  ;;  %v1642_v8 = vpop.permute.xlu2 %1641 }
 0xbe5   :  { %v2251_v38 = vpop.eup %2250  ;;  %v1647_v22 = vsel %vm282_vm9, %v1642_v8, 0 }
 0xbe6   :  { %v1464_v41 = vmul.f32 %v2251_v38, %v1447_v30  ;;  %v2253_v18 = vpop.eup %2252  ;;  %v1456_v7 = vsel %vm1455_vm6, %v2249_v32, %v1452_v40  ;;  %vm1469_vm12 = vweird.f32 %v2251_v38 }
 0xbe7   :  { %v1589_v50 = vmul.f32 %v2253_v18, %v1584_v37  ;;  %v1461_v51 = vsel %vm1458_vm11, %v1460_v59, %v1456_v7  ;;  %v2255_v54 = vpop.eup %2254  ;;  %vm1470_vm14 = vmor %vm1468_vm13, %vm1469_vm12  ;;  %vm1594_vm0 = vweird.f32 %v2253_v18  ;;  %vm1598_vm11 = vcmp.eq.f32.partialorder %v1597_v5, 8.507059e+37 }
 0xbe8   :  { %v1465_v2 = vsub.f32 1.0, %v1464_v41  ;;  %v1462_v44 = vmul.f32 %v2775_v16, %v1461_v51  ;;  %v1604_v60 = vmul.f32 %v2255_v54, %v2806_v42  ;;  %v1599_v16 = vand.u32 2147483648, %v1584_v37  ;;  %vm1595_vm6 = vmor %vm1593_vm3, %vm1594_vm0 }
 0xbe9   :  { %v1590_v12 = vsub.f32 1.0, %v1589_v50  ;;  %vm1609_vm12 = vweird.f32 %v2255_v54  ;;  %vm1608_vm13 = vweird.f32 %v2806_v42  ;;  %vm2956_vm0 = vcmask 1040384  }
 0xbea   :  { %v1466_v36 = vmul.f32 %v2251_v38, %v1465_v2  ;;  %v1478_v1 = vpack.c.bf16 %v1462_v44, %v1462_v44  ;;  %v1605_v4 = vsub.f32 1.0, %v1604_v60  ;;  %v1600_v9 = vor.u32 1.1754944e-38, %v1599_v16 }
 0xbeb   :  { %v1591_v61 = vmul.f32 %v2253_v18, %v1590_v12 }
 0xbec   :  { %v1467_v52 = vadd.f32 %v2251_v38, %v1466_v36  ;;  %v1606_v13 = vmul.f32 %v2255_v54, %v1605_v4 }
 0xbed   :  { %v1592_v43 = vadd.f32 %v2253_v18, %v1591_v61 }
 0xbee   :  { %v1471_v63 = vsel %vm1470_vm14, %v2251_v38, %v1467_v52  ;;  %v1607_v24 = vadd.f32 %v2255_v54, %v1606_v13  ;;  %vm1610_vm14 = vmor %vm1608_vm13, %vm1609_vm12 }
 0xbef   :  { %v1476_v3 = vsel %vm1473_vm15, %v1475_v49, %v1471_v63  ;;  %v1596_v14 = vsel %vm1595_vm6, %v2253_v18, %v1592_v43  ;;  %vm1613_vm15 = vcmp.eq.f32.partialorder %v1612_v25, 8.507059e+37 }
 0xbf0   :  { %v1477_v29 = vmul.f32 %v2781_v21, %v1476_v3  ;;  %v1601_v0 = vsel %vm1598_vm11, %v1600_v9, %v1596_v14  ;;  %v1614_v21 = vand.u32 2147483648, %v2806_v42  ;;  %v1611_v53 = vsel %vm1610_vm14, %v2255_v54, %v1607_v24  ;;  %v2110_v54 = vld [vmem:[%s2922_s4 + $0x18] sm:$0xff] }
 0xbf1   :  { %v1602_v32 = vmul.f32 %v2779_v17, %v1601_v0  ;;  %1719 = vmatpush.bf16.msrb.mxu0 %v2110_v54 }
 0xbf2   :  { %v1479_v23 = vpack.c.bf16 %v1477_v29, %v1477_v29  ;;  %v1615_v31 = vor.u32 1.1754944e-38, %v1614_v21 }
 0xbf3   :  { %v1618_v34 = vpack.c.bf16 %v1602_v32, %v1602_v32  ;;  %v2173_v32 = vld [vmem:[%s2923_s5 + $0x1] ss:$0 sm:$0xff] }
 0xbf4   :  { %v1616_v33 = vsel %vm1613_vm15, %v1615_v31, %v1611_v53 }
 0xbf5   :  { %v1617_v35 = vmul.f32 %v2765_v62, %v1616_v33  ;;  %1720 = vmatpush.bf16.msrb.mxu0 %v2109_v57 }
 0xbf6   :  { %v1481_v55 = vpop.permute.xlu1 %1480 }
 0xbf7   :  { %v1486_v56 = vsel %vm282_vm9, %v1481_v55, 0  ;;  %v1619_v6 = vpack.c.bf16 %v1617_v35, %v1617_v35 }
 0xbf8   :  { %1495 = vmatpush.bf16.msrb.mxu2 %v1486_v56 }
 0xbfb   :  { %2035 = vmatmul.msk.bf16.vlgmr.msrb.gmra.mxu2 %vm181_vm8, %v1478_v1 }
 0xbfe   :  { %v1502_v11 = vpop.permute.xlu1 %1501 }
 0xbff   :  { %v1507_v15 = vsel %vm282_vm9, %v1502_v11, 0 }
 0xc00   :  { %1516 = vmatpush.bf16.msra.mxu3 %v1507_v15 }
 0xc03   :  { %2036 = vmatmul.msk.bf16.vlgmr.msra.gmra.mxu3 %vm181_vm8, %v1479_v23 }
 0xc04   :  { %1656 = vmatpush.bf16.msrb.mxu3 %v1647_v22 }
 0xc06   :  { %v1621_v27 = vpop.permute.xlu1 %1620 }
 0xc07   :  { %v1626_v30 = vsel %vm282_vm9, %v1621_v27, 0  ;;  %vm2953_vm9 = vcmask 261120  }
 0xc08   :  { %1635 = vmatpush.bf16.msra.mxu2 %v1626_v30  ;;  %v1750_v30 = vadd.f32 %v2173_v32, %v2652_v45 }
 0xc0b   :  { %2039 = vmatmul.msk.bf16.vlgmr.msra.gmra.mxu2 %vm181_vm8, %v1618_v34 }
 0xc13   :  { %2040 = vmatmul.msk.bf16.vlgmr.msrb.gmra.mxu3 %vm181_vm8, %v1619_v6 }
 0xc24   :  { %v1217_v37 = vpop.f32.mrf.mxu2 }
 0xc2b   :  { %v1238_v38 = vpop.f32.mrf.mxu3 }
 0xc2c   :  { %v1219_v17 = vpop.f32.mrf.mxu2 }
 0xc33   :  { %v1240_v39 = vpop.f32.mrf.mxu3 }
 0xc34   :  { %v1357_v41 = vpop.f32.mrf.mxu2 }
 0xc3c   :  { %v1359_v42 = vpop.f32.mrf.mxu2 }
 0xc67   :  { %v1378_v40 = vpop.f32.mrf.mxu3 }
 0xc68   :  { %v2149_v2 = vpack.i.bf16 %v1378_v40, %v1357_v41 }
 0xc6a   :  { %2150 = vrot.lane.b32.xlu1 %v2149_v2, %s2950_s2 }
 0xc6f   :  { %v1380_v18 = vpop.f32.mrf.mxu3 }
 0xc7e   :  { %v1497_v46 = vpop.f32.mrf.mxu2 }
 0xc86   :  { %v1499_v47 = vpop.f32.mrf.mxu2  ;;  %v1518_v7 = vpop.f32.mrf.mxu3 }
 0xc87   :  { %v2154_v50 = vpack.i.bf16 %v1518_v7, %v1497_v46 }
 0xc89   :  { %2155 = vrot.lane.b32.xlu0 %v2154_v50, %s2951_s15 }
 0xc8e   :  { %v1520_v62 = vpop.f32.mrf.mxu3  ;;  %v1637_v36 = vpop.f32.mrf.mxu2 }
 0xc96   :  { %v1639_v59 = vpop.f32.mrf.mxu2  ;;  %v1658_v51 = vpop.f32.mrf.mxu3 }
 0xc97   :  { %v2159_v12 = vpack.i.bf16 %v1658_v51, %v1637_v36  ;;  %v2112_v59 = vld [vmem:[%s2926_s8 + $0x18] sm:$0xff] }
 0xc98   :  { %1862 = vmatpush.bf16.msrb.mxu1 %v2112_v59 }
 0xc99   :  { %2160 = vrot.lane.b32.xlu1 %v2159_v12, %s2952_s17  ;;  %v2111_v12 = vld [vmem:[%s2926_s8 + $0x10] sm:$0xff] }
 0xc9c   :  { %1863 = vmatpush.bf16.msrb.mxu1 %v2111_v12 }
 0xc9e   :  { %v1660_v52 = vpop.f32.mrf.mxu3 }
 0xcdc   :  { %v2151_v44 = vpop.permute.xlu1 %2150 }
 0xcdd   :  { %v2153_v55 = vunpack.i.h.bf16 %v2151_v44  ;;  %v2152_v60 = vunpack.i.l.bf16 %v2151_v44 }
 0xcdf   :  { %v1687_v49 = vsel %vm181_vm8, %v1238_v38, %v2153_v55  ;;  %v1686_v1 = vsel %vm181_vm8, %v1217_v37, %v2152_v60  ;;  %vm2954_vm8 = vcmask 1046528   ;;  %v1751_v37 = vadd.f32 %v2173_v32, %v2657_v48  ;;  %v2176_v32 = vld [vmem:[%s2927_s9 + $0x1] ss:$0 sm:$0xff] }
 0xcfb   :  { %v2156_v58 = vpop.permute.xlu0 %2155 }
 0xcfc   :  { %v2158_v61 = vunpack.i.h.bf16 %v2156_v58  ;;  %v2157_v63 = vunpack.i.l.bf16 %v2156_v58 }
 0xcfe   :  { %v1689_v43 = vsel %vm766_vm1, %v1687_v49, %v2158_v61  ;;  %v1688_v16 = vsel %vm766_vm1, %v1686_v1, %v2157_v63  ;;  %vm2955_vm1 = vmmov %vm2954_vm8 }
 0xd0b   :  { %v2161_v56 = vpop.permute.xlu1 %2160 }
 0xd0c   :  { %v2163_v3 = vunpack.i.h.bf16 %v2161_v56  ;;  %v2162_v4 = vunpack.i.l.bf16 %v2161_v56 }
 0xd0e   :  { %v1691_v5 = vsel %vm769_vm2, %v1689_v43, %v2163_v3  ;;  %v1690_v29 = vsel %vm769_vm2, %v1688_v16, %v2162_v4  ;;  %vm2957_vm2 = vmmov %vm2956_vm0 }
 0xd0f   :  { %v1692_v8 = vpack.c.bf16 %v1691_v5, %v1690_v29 }
 0xd11   :  { %2053 = vmatmul.msk.bf16.vlgmr.msrb.gmra.mxu0 %vm2953_vm9, %v1692_v8  ;;  %v2175_v8 = vld [vmem:[%s2925_s7 + $0x1] ss:$0 sm:$0xff] }
 0xd8e   :  { %v1722_v11 = vpop.f32.mrf.mxu0 }
 0xd8f   :  { %1754 = vrot.lane.b32.xlu1 %v1722_v11, %s2289_s16  ;;  %v1729_v14 = vrot.slane %v1722_v11, 7  ;;  %v1737_v15 = vrot.slane %v1722_v11, 1 }
 0xd91   :  { %v1734_v27 = vsel %vm2957_vm2, 0.0, %v1729_v14 }
 0xd92   :  { %v1735_v53 = vsel %vm2590_vm10, 0.0, %v1734_v27 }
 0xd93   :  { %v1752_v20 = vadd.f32 %v1750_v30, %v1735_v53 }
 0xd96   :  { %v1724_v13 = vpop.f32.mrf.mxu0 }
 0xd97   :  { %v1730_v9 = vrot.slane %v1724_v13, 7  ;;  %v1738_v22 = vrot.slane %v1724_v13, 1  ;;  %1756 = vrot.lane.b32.xlu0 %v1724_v13, %s2289_s16 }
 0xd99   :  { %v1742_v23 = vsel %vm2954_vm8, %v1738_v22, 0.0  ;;  %v1739_v0 = vsel %vm2955_vm1, %v1737_v15, %v1738_v22  ;;  %v1731_v24 = vsel %vm2956_vm0, %v1729_v14, %v1730_v9 }
 0xd9a   :  { %v1744_v21 = vsel %vm2570_vm5, 0.0, %v1742_v23  ;;  %v1743_v25 = vsel %vm2566_vm4, 0.0, %v1739_v0  ;;  %vm2958_vm4 = vmmov %vm2953_vm9  ;;  %v1736_v6 = vsel %vm2585_vm7, 0.0, %v1731_v24  ;;  %v2116_v23 = vld [vmem:[%s2928_s10 + $0x38] sm:$0xff]  ;;  %v2115_v0 = vld [vmem:[%s2928_s10 + $0x30] sm:$0xff]  ;;  %vm2963_vm9 = vcmask 523264  }
 0xd9b   :  { %1766 = vrot.lane.b32.xlu1 %v1744_v21, %s2295_s22  ;;  %1764 = vrot.lane.b32.xlu2 %v1743_v25, %s2295_s22  ;;  %v1753_v28 = vadd.f32 %v1751_v37, %v1736_v6  ;;  %vm2959_vm5 = vmmov %vm2958_vm4  ;;  %v2114_v24 = vld [vmem:[%s2928_s10 + $0x28] sm:$0xff]  ;;  %v2113_v21 = vld [vmem:[%s2928_s10 + $0x20] sm:$0xff] }
 0xd9c   :  { %vm2960_vm10 = vmmov %vm2958_vm4  ;;  %1918 = vmatpush.bf16.msrb.mxu2 %v2116_v23 }
 0xd9d   :  { %vm2961_vm7 = vmmov %vm2958_vm4 }
 0xd9e   :  { %vm2962_vm15 = vmmov %vm2958_vm4 }
 0xd9f   :  { %vm2964_vm8 = vmmov %vm2958_vm4 }
 0xda0   :  { %1919 = vmatpush.bf16.msrb.mxu2 %v2115_v0  ;;  %vm2965_vm1 = vmmov %vm2958_vm4 }
 0xda4   :  { %1920 = vmatpush.bf16.msrb.mxu2 %v2114_v24 }
 0xda8   :  { %1921 = vmatpush.bf16.msrb.mxu2 %v2113_v21 }
 0xdf5   :  { %v1765_v19 = vpop.permute.xlu2 %1764 }
 0xe01   :  { %v1755_v31 = vpop.permute.xlu1 %1754 }
 0xe02   :  { %v1760_v34 = vadd.f32 %v1755_v31, %v1752_v20 }
 0xe04   :  { %v2859_v33 = vadd.f32 %v1765_v19, %v1760_v34  ;;  %v2177_v19 = vld [vmem:[%s2929_s11 + $0x1] ss:$0 sm:$0xff]  ;;  %s2303_s11 = smov 128  }
 0xe06   :  { %v1772_v35 = vsel %vm2958_vm4, %v2859_v33, 0.0 }
 0xe07   :  { %1773 = vadd.xlane.f32.xlu0 %v1772_v35 }
 0xe09   :  { %v1757_v38 = vpop.permute.xlu0 %1756 }
 0xe0a   :  { %v1761_v17 = vadd.f32 %v1757_v38, %v1753_v28 }
 0xe0d   :  { %v1767_v39 = vpop.permute.xlu1 %1766 }
 0xe0e   :  { %v2866_v45 = vadd.f32 %v1767_v39, %v1761_v17 }
 0xe10   :  { %v1775_v41 = vsel %vm2959_vm5, %v2866_v45, 0.0 }
 0xe11   :  { %1776 = vadd.xlane.f32.xlu2 %v1775_v41 }
 0xe7a   :  { %v1774_v42 = vpop.xlane.xlu0 %1773 }
 0xe7b   :  { %v1778_v40 = vmul.f32 %v1774_v42, %v2380_v10 }
 0xe7d   :  { %v1780_v2 = vsub.f32 %v2859_v33, %v1778_v40 }
 0xe7f   :  { %v1782_v18 = vmul.f32 %v1780_v2, %v1780_v2 }
 0xe81   :  { %v1784_v26 = vsel %vm2960_vm10, %v1782_v18, 0.0 }
 0xe82   :  { %1785 = vadd.xlane.f32.xlu1 %v1784_v26 }
 0xe84   :  { %v1777_v48 = vpop.xlane.xlu2 %1776 }
 0xe85   :  { %v1779_v46 = vmul.f32 %v1777_v48, %v2380_v10 }
 0xe87   :  { %v1781_v47 = vsub.f32 %v2866_v45, %v1779_v46 }
 0xe89   :  { %v1783_v7 = vmul.f32 %v1781_v47, %v1781_v47 }
 0xe8b   :  { %v1787_v50 = vsel %vm2961_vm7, %v1783_v7, 0.0 }
 0xe8c   :  { %1788 = vadd.xlane.f32.xlu0 %v1787_v50 }
 0xef5   :  { %v1786_v62 = vpop.xlane.xlu1 %1785 }
 0xef6   :  { %v1790_v36 = vmul.f32 %v1786_v62, %v2380_v10 }
 0xef8   :  { %v1792_v51 = vadd.f32 1e-05, %v1790_v36 }
 0xefa   :  { %2256 = vrsqrt.f32 %v1792_v51  ;;  %vm1800_vm6 = vweird.f32 %v1792_v51 }
 0xeff   :  { %v1789_v52 = vpop.xlane.xlu0 %1788 }
 0xf00   :  { %v2257_v54 = vpop.eup %2256  ;;  %v1791_v57 = vmul.f32 %v1789_v52, %v2380_v10  ;;  %v2174_v10 = vld [vmem:[%s2924_s6 + $0x1] ss:$0 sm:$0xff] }
 0xf01   :  { %v1795_v44 = vmul.f32 %v2257_v54, %v1792_v51  ;;  %vm1801_vm3 = vweird.f32 %v2257_v54 }
 0xf02   :  { %v1793_v58 = vadd.f32 1e-05, %v1791_v57  ;;  %vm1802_vm11 = vmor %vm1800_vm6, %vm1801_vm3 }
 0xf03   :  { %v1796_v55 = vmul.f32 %v2257_v54, %v1795_v44 }
 0xf04   :  { %2258 = vrsqrt.f32 %v1793_v58  ;;  %vm1810_vm13 = vweird.f32 %v1793_v58 }
 0xf05   :  { %v1797_v60 = vmul.f32 0.5, %v1796_v55 }
 0xf07   :  { %v1798_v61 = vsub.f32 1.5, %v1797_v60 }
 0xf09   :  { %v1799_v56 = vmul.f32 %v2257_v54, %v1798_v61 }
 0xf0a   :  { %v2259_v63 = vpop.eup %2258 }
 0xf0b   :  { %v1805_v49 = vmul.f32 %v2259_v63, %v1793_v58  ;;  %v1803_v3 = vsel %vm1802_vm11, %v2257_v54, %v1799_v56  ;;  %vm1811_vm12 = vweird.f32 %v2259_v63 }
 0xf0c   :  { %v1814_v16 = vmul.f32 %v1803_v3, %v1780_v2  ;;  %vm1812_vm14 = vmor %vm1810_vm13, %vm1811_vm12 }
 0xf0d   :  { %v1806_v1 = vmul.f32 %v2259_v63, %v1805_v49 }
 0xf0e   :  { %v1821_v11 = vmul.f32 %v2174_v10, %v1814_v16 }
 0xf0f   :  { %v1807_v4 = vmul.f32 0.5, %v1806_v1 }
 0xf10   :  { %v1828_v15 = vadd.f32 %v2175_v8, %v1821_v11 }
 0xf11   :  { %v1808_v43 = vsub.f32 1.5, %v1807_v4 }
 0xf13   :  { %v1809_v5 = vmul.f32 %v2259_v63, %v1808_v43 }
 0xf15   :  { %v1813_v29 = vsel %vm1812_vm14, %v2259_v63, %v1809_v5 }
 0xf16   :  { %v1815_v13 = vmul.f32 %v1813_v29, %v1781_v47 }
 0xf18   :  { %v1822_v14 = vmul.f32 %v2174_v10, %v1815_v13 }
 0xf1a   :  { %v1829_v9 = vadd.f32 %v2175_v8, %v1822_v14 }
 0xf1c   :  { %v1830_v22 = vpack.c.bf16 %v1829_v9, %v1828_v15 }
 0xf1e   :  { %2070 = vmatmul.msk.bf16.vlgmr.msrb.gmra.mxu1 %vm2962_vm15, %v1830_v22 }
 0xf9b   :  { %v1865_v25 = vpop.f32.mrf.mxu1 }
 0xf9c   :  { %v1866_v27 = vadd.f32 %v2176_v32, %v1865_v25 }
 0xf9e   :  { %v1870_v20 = vmax.f32 %v1866_v27, 0.0 }
 0xfa3   :  { %v1867_v53 = vpop.f32.mrf.mxu1 }
 0xfa4   :  { %v1868_v30 = vadd.f32 %v2176_v32, %v1867_v53 }
 0xfa6   :  { %v1871_v31 = vmax.f32 %v1868_v30, 0.0 }
 0xfa8   :  { %v1872_v34 = vpack.c.bf16 %v1871_v31, %v1870_v20 }
 0xfaa   :  { %2096 = vmatmul.msk.bf16.vlgmr.msrb.gmra.mxu2 %vm2963_vm9, %v1872_v34 }
0x102d   :  { %v1923_v35 = vpop.f32.mrf.mxu2 }
0x102e   :  { %v1924_v6 = vadd.f32 %v2177_v19, %v1923_v35 }
0x1030   :  { %v1928_v37 = vadd.f32 %v1924_v6, %v2859_v33 }
0x1032   :  { %1930 = vst.msk [vmem:[#allocation2] sm:$0xff] %vm2964_vm8, %v1928_v37 }
0x1035   :  { %v1925_v38 = vpop.f32.mrf.mxu2 }
0x1036   :  { %v1926_v28 = vadd.f32 %v2177_v19, %v1925_v38 }
0x1038   :  { %v1929_v17 = vadd.f32 %v1926_v28, %v2866_v45 }
0x103a   :  { %1931 = vst.msk [vmem:[#allocation2 + $0x8] sm:$0xff] %vm2965_vm1, %v1929_v17 }
0x103b   :  { %1944 = dma.vmem_to_hbm [thread:$0]  %s1937_s20, 256, %s1939_s18, [#allocation3], %s2303_s11, %s2303_s11, %s2950_s2  }
0x103c   :  { %2285 = dma.done.wait [#allocation3], 256  }
0x103d   :  { %2286 = vsyncadd [#allocation3], 4294967040 }
0x103e   :  { %1949 = vsyncpa [#allocation3], 1 }

</bundles_post_ra>
